<compile_context>
chip_gen: v6e
topology: v6e:2x2x1
jax: 0.10.0
libtpu: 0.0.40
codegen_flags: <defaults>
</compile_context>

<pallas_src>
import jax
import jax.numpy as jnp
from jax import lax
from jax.experimental import pallas as pl
from jax.experimental.pallas import tpu as pltpu

# ----------------------------- configuration --------------------------------
B   = 2                 # batch
C   = 8                 # in_chans
T   = 512               # in_samples
NW  = 3                 # n_windows
F1  = 4                 # eegn_F1 (temporal filters)
DM  = 2                 # eegn_D  (depth multiplier)
F2  = F1 * DM           # 8  (= MSA embed dim = TCN input dim)
K1  = 16                # temporal conv kernel ('same')
K2  = 16                # spatial conv kernel ('same', fixed in module)
P1  = 8                 # pool_size1
P2  = 8                 # eegn_poolSize
T1  = T // P1           # 64
T2  = T1 // P2          # 8
L   = T2 - NW + 1       # 6  (sliding-window length)
E   = F2                # MSA embed dim
H   = 2                 # MSA heads
DH  = E // H            # head dim
TK  = 4                 # tcn kernel size
TF  = F2                # tcn filters (== E -> no convInput residual projection)
PADT = TK - 1           # causal left pad
NC  = 4                 # n_classes
EPS = 1e-5
CK1 = C * K1            # 128 (im2col contraction for temporal+depthwise conv)
PW  = T1 + K2 - 1       # 79  (pooled width incl. folded 'same' pad)


def _elu(x):
    # exp only on the non-positive branch (cheaper on EUP, avoids inf-then-mask)
    return jnp.where(x > 0, x, jnp.exp(jnp.minimum(x, 0.0)) - 1.0)


# ===========================  fused forward kernel  ==========================
# One grid step = one batch element, end to end.
def atcnet_kernel(xcol_ref, wcsp_ref, p1p_ref, p2t_ref,
                  wint_ref, woutt_ref, wtcn_ref, wdt_ref, pvec_ref, o_ref):
    f32 = jnp.float32

    # -------- Convolution_module (channels-first, time on lanes) --------
    wcsp = wcsp_ref[...]                                   # (2*F2, CK1+1) packed weights
    wc, bc = wcsp[0:F2, 0:CK1], wcsp[0:F2, CK1:CK1 + 1]
    ws, bs = wcsp[F2:2 * F2, 0:CK1], wcsp[F2:2 * F2, CK1:CK1 + 1]

    # temporal + depthwise conv + BN1 + BN2 + ELU : one K=128 MXU matmul
    h2 = _elu(jnp.dot(wc, xcol_ref[0], preferred_element_type=f32) + bc)     # (F2, T)
    # avg-pool1 with the spatial conv's 'same' pad folded into the pooling matrix
    hp = jnp.dot(h2, p1p_ref[...], preferred_element_type=f32)               # (F2, PW)
    # spatial 'same' conv + BN3 + ELU : im2col (k-major rows) + one K=128 matmul
    col = jnp.concatenate([hp[:, k:k + T1] for k in range(K2)], axis=0)      # (K2*F2, T1)
    h4 = _elu(jnp.dot(ws, col, preferred_element_type=f32) + bs)             # (F2, T1)
    # avg-pool2, produced directly time-major via transposed-RHS contraction
    hT = lax.dot_general(p2t_ref[...], h4, (((1,), (1,)), ((), ())),
                         preferred_element_type=f32)                         # (T2, F2)

    # -------- sliding windows: MHA -> TCN -> dense, average fuse --------
    acc = jnp.zeros((1, NC), f32)
    for w in range(NW):
        xw = hT[w:w + L, :]                                # (L, E)
        pv = pvec_ref[w]                                   # (8, 3E) packed small vectors
        b_in  = pv[0:1, :]                                 # (1, 3E)
        b_out = pv[1:2, 0:E]                               # (1, E)
        sh1   = pv[2:3, 0:TF]                              # (1, TF)  conv1 bias+BN shift
        sh2   = pv[3:4, 0:TF]                              # (1, TF)  conv2 bias+BN shift
        bd    = pv[4:5, 0:NC]                              # (1, NC)

        # ---- MultiheadAttention (q-scale folded into W_in host-side) ----
        qkv = jnp.dot(xw, wint_ref[w], preferred_element_type=f32) + b_in    # (L, 3E)
        q, k_, v = qkv[:, 0:E], qkv[:, E:2 * E], qkv[:, 2 * E:3 * E]
        heads = []
        for h in range(H):
            qh = q[:, h * DH:(h + 1) * DH]
            kh = k_[:, h * DH:(h + 1) * DH]
            vh = v[:, h * DH:(h + 1) * DH]
            s = lax.dot_general(qh, kh, (((1,), (1,)), ((), ())),
                                preferred_element_type=f32)                  # (L, L)
            s = s - jnp.max(s, axis=-1, keepdims=True)
            pexp = jnp.exp(s)
            a = pexp / jnp.sum(pexp, axis=-1, keepdims=True)
            heads.append(jnp.dot(a, vh, preferred_element_type=f32))         # (L, DH)
        ao = jnp.concatenate(heads, axis=1)                                  # (L, E)
        attn = jnp.dot(ao, woutt_ref[w], preferred_element_type=f32) + b_out

        # ---- TCN residual block (time-major, causal, bias+BN folded) ----
        wt = wtcn_ref[w]                                   # (2*TK*E, TF)
        w1m, w2m = wt[0:TK * E, :], wt[TK * E:2 * TK * E, :]
        xp = jnp.concatenate([jnp.zeros((PADT, E), f32), attn], axis=0)      # (L+PADT, E)
        c1 = jnp.concatenate([xp[k:k + L, :] for k in range(TK)], axis=1)    # (L, TK*E)
        t1 = _elu(jnp.dot(c1, w1m, preferred_element_type=f32) + sh1)        # (L, TF)
        hp2 = jnp.concatenate([jnp.zeros((PADT, TF), f32), t1], axis=0)
        c2 = jnp.concatenate([hp2[k:k + L, :] for k in range(TK)], axis=1)
        t2 = _elu(jnp.dot(c2, w2m, preferred_element_type=f32) + sh2)
        tout = _elu(t2 + attn)                                               # (L, TF)

        # ---- dense head on last timestep, accumulate for 'average' fuse ----
        feat = tout[L - 1:L, :]                                              # (1, TF)
        acc = acc + jnp.dot(feat, wdt_ref[w], preferred_element_type=f32) + bd

    o_ref[0] = acc * f32(1.0 / NW)


# ==============================  forward (glue)  =============================
def _const_spec(shape):
    nd = len(shape)
    return pl.BlockSpec(tuple(shape), lambda b: (0,) * nd)


def atcnet_forward(x, p):
    # 'same' pad in time + im2col so the fused temporal+depthwise conv is a single
    # contraction-128 matmul in the kernel.
    xpad = jnp.pad(x, ((0, 0), (0, 0), ((K1 - 1) // 2, K1 // 2)))        # (B, C, T+K1-1)
    xcol = jnp.stack([xpad[:, :, k:k + T] for k in range(K1)], axis=2)   # (B, C, K1, T)
    xcol = xcol.reshape(B, CK1, T)

    out = pl.pallas_call(
        atcnet_kernel,
        out_shape=jax.ShapeDtypeStruct((B, 1, NC), jnp.float32),
        grid=(B,),
        in_specs=[
            pl.BlockSpec((1, CK1, T), lambda b: (b, 0, 0)),   # im2col'd input
            _const_spec((2 * F2, CK1 + 1)),                   # packed conv weights+biases
            _const_spec((T, PW)),                             # pool1 @ 'same'-pad
            _const_spec((T2, T1)),                            # pool2^T
            _const_spec((NW, E, 3 * E)),                      # W_in^T per window
            _const_spec((NW, E, E)),                          # W_out^T per window
            _const_spec((NW, 2 * TK * E, TF)),                # TCN conv1|conv2 folded
            _const_spec((NW, TF, NC)),                        # dense W^T per window
            _const_spec((NW, 8, 3 * E)),                      # packed per-window vectors
        ],
        out_specs=pl.BlockSpec((1, 1, NC), lambda b: (b, 0, 0)),
        compiler_params=pltpu.CompilerParams(
            dimension_semantics=("parallel",)),
    )(xcol, p['wcsp'], p['pool1pad'], p['pool2t'],
      p['wint'], p['woutt'], p['wtcn'], p['wdt'], p['pvec'])
    return out.reshape(B, NC)


atcnet_forward_jit = jax.jit(atcnet_forward)


# ==========================  deterministic parameters  =======================
class KeyGen:
    def __init__(self, key):
        self.key = key

    def __call__(self):
        self.key, sub = jax.random.split(self.key)
        return sub


def avgpool_matrix(t_in, pool):
    t = jnp.arange(t_in)[:, None]
    u = jnp.arange(t_in // pool)[None, :]
    return jnp.where((t >= u * pool) & (t < (u + 1) * pool),
                     1.0 / pool, 0.0).astype(jnp.float32)


def pad_matrix(n, left, total):
    m = jnp.zeros((n, n + total), jnp.float32)
    return m.at[jnp.arange(n), jnp.arange(n) + left].set(1.0)


def init_params(seed=0):
    kg = KeyGen(jax.random.PRNGKey(seed))

    def nrm(shape, s=0.1):
        return (s * jax.random.normal(kg(), shape)).astype(jnp.float32)

    def bn_fold(n):
        gamma = 1.0 + 0.1 * jax.random.normal(kg(), (n,))
        beta = 0.1 * jax.random.normal(kg(), (n,))
        mean = 0.1 * jax.random.normal(kg(), (n,))
        var = jax.random.uniform(kg(), (n,), minval=0.5, maxval=1.5)
        scale = (gamma / jnp.sqrt(var + EPS)).astype(jnp.float32)
        shift = (beta - mean * scale).astype(jnp.float32)
        return scale, shift

    p = {}
    # ---- Convolution_module raw params ----
    w_temp = nrm((F1, K1), 0.2)          # Conv2d(1, F1, (1, K1)) weight [g, k]
    s1, b1 = bn_fold(F1)
    w_depth = nrm((F2, C), 0.2)          # Conv2d(F1, F2, (C, 1), groups=F1) weight [f2, c]
    s2, b2 = bn_fold(F2)
    w_sp = nrm((F2, F2, K2), 0.15)       # Conv2d(F2, F2, (1, K2)) weight [f, f', k]
    s3, b3 = bn_fold(F2)

    g_of = jnp.arange(F2) // DM          # group of each output channel
    # temporal * depthwise * BN1 * BN2 folded into one (F2, C*K1) weight + bias
    wc = (w_depth[:, :, None] * w_temp[g_of][:, None, :]).reshape(F2, CK1)
    wc = wc * (s1[g_of] * s2)[:, None]
    bc = s2 * (b1[g_of] * jnp.sum(w_depth, axis=1)) + b2
    # spatial conv * BN3, flattened k-major to match the in-kernel im2col ordering
    ws = jnp.transpose(w_sp, (0, 2, 1)).reshape(F2, K2 * F2) * s3[:, None]
    p['wcsp'] = jnp.concatenate(
        [jnp.concatenate([wc, bc[:, None]], axis=1),
         jnp.concatenate([ws, b3[:, None]], axis=1)], axis=0)        # (16, 129)

    pool1 = avgpool_matrix(T, P1)                                    # (T, T1)
    sppad = pad_matrix(T1, (K2 - 1) // 2, K2 - 1)                    # (T1, PW)
    p['pool1pad'] = jnp.dot(pool1, sppad)                            # (T, PW)
    p['pool2t'] = avgpool_matrix(T1, P2).T                           # (T2, T1)

    q_scale = 1.0 / (DH ** 0.5)
    wint_l, woutt_l, wtcn_l, wdt_l, pvec_l = [], [], [], [], []
    for _ in range(NW):
        # MultiheadAttention(embed=E, heads=H)
        w_in = nrm((3 * E, E), 0.2)
        b_in = nrm((3 * E,), 0.05)
        w_out = nrm((E, E), 0.2)
        b_out = nrm((E,), 0.05)
        w_in = w_in.at[0:E, :].multiply(q_scale)     # fold q scaling into the projection
        b_in = b_in.at[0:E].multiply(q_scale)
        wint_l.append(w_in.T)                        # (E, 3E)
        woutt_l.append(w_out.T)                      # (E, E)

        # TCN residual block (depth=2 -> one residual block in the forward pass)
        w1 = nrm((TF, E, TK), 0.2);  cb1 = nrm((TF,), 0.05)
        sA, shA = bn_fold(TF)
        w2 = nrm((TF, TF, TK), 0.2); cb2 = nrm((TF,), 0.05)
        sB, shB = bn_fold(TF)
        w1m = jnp.transpose(w1, (2, 1, 0)).reshape(TK * E, TF) * sA[None, :]
        w2m = jnp.transpose(w2, (2, 1, 0)).reshape(TK * TF, TF) * sB[None, :]
        sh1 = cb1 * sA + shA
        sh2 = cb2 * sB + shB
        wtcn_l.append(jnp.concatenate([w1m, w2m], axis=0))           # (2*TK*E, TF)

        # dense head
        wd = nrm((NC, TF), 0.2)
        bd = nrm((NC,), 0.05)
        wdt_l.append(wd.T)                                           # (TF, NC)

        pv = jnp.zeros((8, 3 * E), jnp.float32)
        pv = pv.at[0, :].set(b_in)
        pv = pv.at[1, 0:E].set(b_out)
        pv = pv.at[2, 0:TF].set(sh1)
        pv = pv.at[3, 0:TF].set(sh2)
        pv = pv.at[4, 0:NC].set(bd)
        pvec_l.append(pv)

    p['wint'] = jnp.stack(wint_l)
    p['woutt'] = jnp.stack(woutt_l)
    p['wtcn'] = jnp.stack(wtcn_l)
    p['wdt'] = jnp.stack(wdt_l)
    p['pvec'] = jnp.stack(pvec_l)
    return p


# ==================================  main  ===================================
if __name__ == "__main__":
    kx = jax.random.PRNGKey(0)
    x = jax.random.normal(kx, (B, C, T), dtype=jnp.float32)   # (batch, in_chans, in_samples)
    params = init_params(seed=0)

    out = atcnet_forward_jit(x, params)
    out = jax.block_until_ready(out)

    assert out.shape == (B, NC), out.shape
    assert bool(jnp.all(jnp.isfinite(out)))
    print("KERNEL_OK")
</pallas_src>

<mosaic_0001>
module attributes {stable_mosaic.version = 11 : i64} {
  func.func @atcnet_kernel(%arg0: i32, %arg1: memref<1x128x512xf32, #tpu.memory_space<vmem>>, %arg2: memref<16x129xf32, #tpu.memory_space<vmem>>, %arg3: memref<512x79xf32, #tpu.memory_space<vmem>>, %arg4: memref<8x64xf32, #tpu.memory_space<vmem>>, %arg5: memref<3x8x24xf32, #tpu.memory_space<vmem>>, %arg6: memref<3x8x8xf32, #tpu.memory_space<vmem>>, %arg7: memref<3x64x8xf32, #tpu.memory_space<vmem>>, %arg8: memref<3x8x4xf32, #tpu.memory_space<vmem>>, %arg9: memref<3x8x24xf32, #tpu.memory_space<vmem>>, %arg10: memref<1x1x4xf32, #tpu.memory_space<vmem>>) attributes {dimension_semantics = [#tpu.dimension_semantics<parallel>], iteration_bounds = array<i64: 2>, scalar_prefetch = 0 : i64, scratch_operands = 0 : i64, tpu.core_type = #tpu.core_type<tc>, window_params = [{transform_indices = @transform_0, window_bounds = array<i64: 1, 128, 512>}, {pipeline_mode = #tpu.pipeline_mode<synchronous>, transform_indices = @transform_1, window_bounds = array<i64: 16, 129>}, {pipeline_mode = #tpu.pipeline_mode<synchronous>, transform_indices = @transform_2, window_bounds = array<i64: 512, 79>}, {pipeline_mode = #tpu.pipeline_mode<synchronous>, transform_indices = @transform_3, window_bounds = array<i64: 8, 64>}, {pipeline_mode = #tpu.pipeline_mode<synchronous>, transform_indices = @transform_4, window_bounds = array<i64: 3, 8, 24>}, {pipeline_mode = #tpu.pipeline_mode<synchronous>, transform_indices = @transform_5, window_bounds = array<i64: 3, 8, 8>}, {pipeline_mode = #tpu.pipeline_mode<synchronous>, transform_indices = @transform_6, window_bounds = array<i64: 3, 64, 8>}, {pipeline_mode = #tpu.pipeline_mode<synchronous>, transform_indices = @transform_7, window_bounds = array<i64: 3, 8, 4>}, {pipeline_mode = #tpu.pipeline_mode<synchronous>, transform_indices = @transform_8, window_bounds = array<i64: 3, 8, 24>}, {transform_indices = @transform_9, window_bounds = array<i64: 1, 1, 4>}]} {
    %c0 = arith.constant 0 : index
    %c0_0 = arith.constant 0 : index
    %0 = vector.load %arg2[%c0, %c0_0] : memref<16x129xf32, #tpu.memory_space<vmem>>, vector<16x129xf32>
    %1 = vector.extract_strided_slice %0 {offsets = [0, 0], sizes = [8, 128], strides = [1, 1]} : vector<16x129xf32> to vector<8x128xf32>
    %2 = vector.extract_strided_slice %0 {offsets = [0, 128], sizes = [8, 1], strides = [1, 1]} : vector<16x129xf32> to vector<8x1xf32>
    %3 = vector.extract_strided_slice %0 {offsets = [8, 0], sizes = [8, 128], strides = [1, 1]} : vector<16x129xf32> to vector<8x128xf32>
    %4 = vector.extract_strided_slice %0 {offsets = [8, 128], sizes = [8, 1], strides = [1, 1]} : vector<16x129xf32> to vector<8x1xf32>
    %c0_1 = arith.constant 0 : index
    %c0_2 = arith.constant 0 : index
    %c0_3 = arith.constant 0 : index
    %5 = vector.load %arg1[%c0_1, %c0_2, %c0_3] : memref<1x128x512xf32, #tpu.memory_space<vmem>>, vector<1x128x512xf32>
    %6 = vector.shape_cast %5 : vector<1x128x512xf32> to vector<128x512xf32>
    %cst = arith.constant dense<0.000000e+00> : vector<8x512xf32>
    %7 = tpu.matmul %1, %6, %cst {dimension_numbers = #tpu.dot_dimension_numbers<[1], [0], [0], [1], [0, 0, 1, 1], [], []>} : vector<8x128xf32>, vector<128x512xf32>, vector<8x512xf32> -> vector<8x512xf32>
    %8 = vector.broadcast %2 : vector<8x1xf32> to vector<8x512xf32>
    %9 = arith.addf %7, %8 : vector<8x512xf32>
    %cst_4 = arith.constant 0.000000e+00 : f32
    %10 = vector.broadcast %cst_4 : f32 to vector<8x512xf32>
    %11 = arith.cmpf ogt, %9, %10 : vector<8x512xf32>
    %cst_5 = arith.constant 0.000000e+00 : f32
    %12 = vector.broadcast %cst_5 : f32 to vector<8x512xf32>
    %13 = arith.minimumf %9, %12 : vector<8x512xf32>
    %14 = math.exp %13 : vector<8x512xf32>
    %cst_6 = arith.constant 1.000000e+00 : f32
    %15 = vector.broadcast %cst_6 : f32 to vector<8x512xf32>
    %16 = arith.subf %14, %15 : vector<8x512xf32>
    %17 = arith.select %11, %9, %16 : vector<8x512xi1>, vector<8x512xf32>
    %c0_7 = arith.constant 0 : index
    %c0_8 = arith.constant 0 : index
    %18 = vector.load %arg3[%c0_7, %c0_8] : memref<512x79xf32, #tpu.memory_space<vmem>>, vector<512x79xf32>
    %cst_9 = arith.constant dense<0.000000e+00> : vector<8x79xf32>
    %19 = tpu.matmul %17, %18, %cst_9 {dimension_numbers = #tpu.dot_dimension_numbers<[1], [0], [0], [1], [0, 0, 1, 1], [], []>} : vector<8x512xf32>, vector<512x79xf32>, vector<8x79xf32> -> vector<8x79xf32>
    %20 = vector.extract_strided_slice %19 {offsets = [0, 0], sizes = [8, 64], strides = [1, 1]} : vector<8x79xf32> to vector<8x64xf32>
    %21 = vector.extract_strided_slice %19 {offsets = [0, 1], sizes = [8, 64], strides = [1, 1]} : vector<8x79xf32> to vector<8x64xf32>
    %22 = vector.extract_strided_slice %19 {offsets = [0, 2], sizes = [8, 64], strides = [1, 1]} : vector<8x79xf32> to vector<8x64xf32>
    %23 = vector.extract_strided_slice %19 {offsets = [0, 3], sizes = [8, 64], strides = [1, 1]} : vector<8x79xf32> to vector<8x64xf32>
    %24 = vector.extract_strided_slice %19 {offsets = [0, 4], sizes = [8, 64], strides = [1, 1]} : vector<8x79xf32> to vector<8x64xf32>
    %25 = vector.extract_strided_slice %19 {offsets = [0, 5], sizes = [8, 64], strides = [1, 1]} : vector<8x79xf32> to vector<8x64xf32>
    %26 = vector.extract_strided_slice %19 {offsets = [0, 6], sizes = [8, 64], strides = [1, 1]} : vector<8x79xf32> to vector<8x64xf32>
    %27 = vector.extract_strided_slice %19 {offsets = [0, 7], sizes = [8, 64], strides = [1, 1]} : vector<8x79xf32> to vector<8x64xf32>
    %28 = vector.extract_strided_slice %19 {offsets = [0, 8], sizes = [8, 64], strides = [1, 1]} : vector<8x79xf32> to vector<8x64xf32>
    %29 = vector.extract_strided_slice %19 {offsets = [0, 9], sizes = [8, 64], strides = [1, 1]} : vector<8x79xf32> to vector<8x64xf32>
    %30 = vector.extract_strided_slice %19 {offsets = [0, 10], sizes = [8, 64], strides = [1, 1]} : vector<8x79xf32> to vector<8x64xf32>
    %31 = vector.extract_strided_slice %19 {offsets = [0, 11], sizes = [8, 64], strides = [1, 1]} : vector<8x79xf32> to vector<8x64xf32>
    %32 = vector.extract_strided_slice %19 {offsets = [0, 12], sizes = [8, 64], strides = [1, 1]} : vector<8x79xf32> to vector<8x64xf32>
    %33 = vector.extract_strided_slice %19 {offsets = [0, 13], sizes = [8, 64], strides = [1, 1]} : vector<8x79xf32> to vector<8x64xf32>
    %34 = vector.extract_strided_slice %19 {offsets = [0, 14], sizes = [8, 64], strides = [1, 1]} : vector<8x79xf32> to vector<8x64xf32>
    %35 = vector.extract_strided_slice %19 {offsets = [0, 15], sizes = [8, 64], strides = [1, 1]} : vector<8x79xf32> to vector<8x64xf32>
    %36 = tpu.concatenate %20, %21, %22, %23, %24, %25, %26, %27, %28, %29, %30, %31, %32, %33, %34, %35 in 0 : vector<8x64xf32>, vector<8x64xf32>, vector<8x64xf32>, vector<8x64xf32>, vector<8x64xf32>, vector<8x64xf32>, vector<8x64xf32>, vector<8x64xf32>, vector<8x64xf32>, vector<8x64xf32>, vector<8x64xf32>, vector<8x64xf32>, vector<8x64xf32>, vector<8x64xf32>, vector<8x64xf32>, vector<8x64xf32> -> vector<128x64xf32>
    %cst_10 = arith.constant dense<0.000000e+00> : vector<8x64xf32>
    %37 = tpu.matmul %3, %36, %cst_10 {dimension_numbers = #tpu.dot_dimension_numbers<[1], [0], [0], [1], [0, 0, 1, 1], [], []>} : vector<8x128xf32>, vector<128x64xf32>, vector<8x64xf32> -> vector<8x64xf32>
    %38 = vector.broadcast %4 : vector<8x1xf32> to vector<8x64xf32>
    %39 = arith.addf %37, %38 : vector<8x64xf32>
    %cst_11 = arith.constant 0.000000e+00 : f32
    %40 = vector.broadcast %cst_11 : f32 to vector<8x64xf32>
    %41 = arith.cmpf ogt, %39, %40 : vector<8x64xf32>
    %cst_12 = arith.constant 0.000000e+00 : f32
    %42 = vector.broadcast %cst_12 : f32 to vector<8x64xf32>
    %43 = arith.minimumf %39, %42 : vector<8x64xf32>
    %44 = math.exp %43 : vector<8x64xf32>
    %cst_13 = arith.constant 1.000000e+00 : f32
    %45 = vector.broadcast %cst_13 : f32 to vector<8x64xf32>
    %46 = arith.subf %44, %45 : vector<8x64xf32>
    %47 = arith.select %41, %39, %46 : vector<8x64xi1>, vector<8x64xf32>
    %c0_14 = arith.constant 0 : index
    %c0_15 = arith.constant 0 : index
    %48 = vector.load %arg4[%c0_14, %c0_15] : memref<8x64xf32, #tpu.memory_space<vmem>>, vector<8x64xf32>
    %cst_16 = arith.constant dense<0.000000e+00> : vector<8x8xf32>
    %49 = tpu.matmul %48, %47, %cst_16 {dimension_numbers = #tpu.dot_dimension_numbers<[1], [1], [0], [0], [0, 0, 1, 0], [], []>} : vector<8x64xf32>, vector<8x64xf32>, vector<8x8xf32> -> vector<8x8xf32>
    %cst_17 = arith.constant 0.000000e+00 : f32
    %50 = vector.broadcast %cst_17 : f32 to vector<1x4xf32>
    %51 = vector.extract_strided_slice %49 {offsets = [0, 0], sizes = [6, 8], strides = [1, 1]} : vector<8x8xf32> to vector<6x8xf32>
    %c0_18 = arith.constant 0 : index
    %c0_19 = arith.constant 0 : index
    %c0_20 = arith.constant 0 : index
    %52 = vector.load %arg9[%c0_18, %c0_19, %c0_20] : memref<3x8x24xf32, #tpu.memory_space<vmem>>, vector<1x8x24xf32>
    %53 = vector.shape_cast %52 : vector<1x8x24xf32> to vector<8x24xf32>
    %54 = vector.extract_strided_slice %53 {offsets = [0, 0], sizes = [1, 24], strides = [1, 1]} : vector<8x24xf32> to vector<1x24xf32>
    %55 = vector.extract_strided_slice %53 {offsets = [1, 0], sizes = [1, 8], strides = [1, 1]} : vector<8x24xf32> to vector<1x8xf32>
    %56 = vector.extract_strided_slice %53 {offsets = [2, 0], sizes = [1, 8], strides = [1, 1]} : vector<8x24xf32> to vector<1x8xf32>
    %57 = vector.extract_strided_slice %53 {offsets = [3, 0], sizes = [1, 8], strides = [1, 1]} : vector<8x24xf32> to vector<1x8xf32>
    %58 = vector.extract_strided_slice %53 {offsets = [4, 0], sizes = [1, 4], strides = [1, 1]} : vector<8x24xf32> to vector<1x4xf32>
    %c0_21 = arith.constant 0 : index
    %c0_22 = arith.constant 0 : index
    %c0_23 = arith.constant 0 : index
    %59 = vector.load %arg5[%c0_21, %c0_22, %c0_23] : memref<3x8x24xf32, #tpu.memory_space<vmem>>, vector<1x8x24xf32>
    %60 = vector.shape_cast %59 : vector<1x8x24xf32> to vector<8x24xf32>
    %cst_24 = arith.constant dense<0.000000e+00> : vector<6x24xf32>
    %61 = tpu.matmul %51, %60, %cst_24 {dimension_numbers = #tpu.dot_dimension_numbers<[1], [0], [0], [1], [0, 0, 1, 1], [], []>} : vector<6x8xf32>, vector<8x24xf32>, vector<6x24xf32> -> vector<6x24xf32>
    %62 = vector.broadcast %54 : vector<1x24xf32> to vector<6x24xf32>
    %63 = arith.addf %61, %62 : vector<6x24xf32>
    %64 = vector.extract_strided_slice %63 {offsets = [0, 0], sizes = [6, 8], strides = [1, 1]} : vector<6x24xf32> to vector<6x8xf32>
    %65 = vector.extract_strided_slice %63 {offsets = [0, 8], sizes = [6, 8], strides = [1, 1]} : vector<6x24xf32> to vector<6x8xf32>
    %66 = vector.extract_strided_slice %63 {offsets = [0, 16], sizes = [6, 8], strides = [1, 1]} : vector<6x24xf32> to vector<6x8xf32>
    %67 = vector.extract_strided_slice %64 {offsets = [0, 0], sizes = [6, 4], strides = [1, 1]} : vector<6x8xf32> to vector<6x4xf32>
    %68 = vector.extract_strided_slice %65 {offsets = [0, 0], sizes = [6, 4], strides = [1, 1]} : vector<6x8xf32> to vector<6x4xf32>
    %69 = vector.extract_strided_slice %66 {offsets = [0, 0], sizes = [6, 4], strides = [1, 1]} : vector<6x8xf32> to vector<6x4xf32>
    %cst_25 = arith.constant dense<0.000000e+00> : vector<6x6xf32>
    %70 = tpu.matmul %67, %68, %cst_25 {dimension_numbers = #tpu.dot_dimension_numbers<[1], [1], [0], [0], [0, 0, 1, 0], [], []>} : vector<6x4xf32>, vector<6x4xf32>, vector<6x6xf32> -> vector<6x6xf32>
    %cst_26 = arith.constant dense<0xFF800000> : vector<6xf32>
    %71 = vector.multi_reduction <maximumf>, %70, %cst_26 [1] : vector<6x6xf32> to vector<6xf32>
    %72 = vector.shape_cast %71 : vector<6xf32> to vector<6x1xf32>
    %73 = vector.broadcast %72 : vector<6x1xf32> to vector<6x6xf32>
    %74 = arith.subf %70, %73 : vector<6x6xf32>
    %75 = math.exp %74 : vector<6x6xf32>
    %cst_27 = arith.constant dense<0.000000e+00> : vector<6xf32>
    %76 = vector.multi_reduction <add>, %75, %cst_27 [1] : vector<6x6xf32> to vector<6xf32>
    %77 = vector.shape_cast %76 : vector<6xf32> to vector<6x1xf32>
    %78 = vector.broadcast %77 : vector<6x1xf32> to vector<6x6xf32>
    %79 = arith.divf %75, %78 : vector<6x6xf32>
    %cst_28 = arith.constant dense<0.000000e+00> : vector<6x4xf32>
    %80 = tpu.matmul %79, %69, %cst_28 {dimension_numbers = #tpu.dot_dimension_numbers<[1], [0], [0], [1], [0, 0, 1, 1], [], []>} : vector<6x6xf32>, vector<6x4xf32>, vector<6x4xf32> -> vector<6x4xf32>
    %81 = vector.extract_strided_slice %64 {offsets = [0, 4], sizes = [6, 4], strides = [1, 1]} : vector<6x8xf32> to vector<6x4xf32>
    %82 = vector.extract_strided_slice %65 {offsets = [0, 4], sizes = [6, 4], strides = [1, 1]} : vector<6x8xf32> to vector<6x4xf32>
    %83 = vector.extract_strided_slice %66 {offsets = [0, 4], sizes = [6, 4], strides = [1, 1]} : vector<6x8xf32> to vector<6x4xf32>
    %cst_29 = arith.constant dense<0.000000e+00> : vector<6x6xf32>
    %84 = tpu.matmul %81, %82, %cst_29 {dimension_numbers = #tpu.dot_dimension_numbers<[1], [1], [0], [0], [0, 0, 1, 0], [], []>} : vector<6x4xf32>, vector<6x4xf32>, vector<6x6xf32> -> vector<6x6xf32>
    %cst_30 = arith.constant dense<0xFF800000> : vector<6xf32>
    %85 = vector.multi_reduction <maximumf>, %84, %cst_30 [1] : vector<6x6xf32> to vector<6xf32>
    %86 = vector.shape_cast %85 : vector<6xf32> to vector<6x1xf32>
    %87 = vector.broadcast %86 : vector<6x1xf32> to vector<6x6xf32>
    %88 = arith.subf %84, %87 : vector<6x6xf32>
    %89 = math.exp %88 : vector<6x6xf32>
    %cst_31 = arith.constant dense<0.000000e+00> : vector<6xf32>
    %90 = vector.multi_reduction <add>, %89, %cst_31 [1] : vector<6x6xf32> to vector<6xf32>
    %91 = vector.shape_cast %90 : vector<6xf32> to vector<6x1xf32>
    %92 = vector.broadcast %91 : vector<6x1xf32> to vector<6x6xf32>
    %93 = arith.divf %89, %92 : vector<6x6xf32>
    %cst_32 = arith.constant dense<0.000000e+00> : vector<6x4xf32>
    %94 = tpu.matmul %93, %83, %cst_32 {dimension_numbers = #tpu.dot_dimension_numbers<[1], [0], [0], [1], [0, 0, 1, 1], [], []>} : vector<6x6xf32>, vector<6x4xf32>, vector<6x4xf32> -> vector<6x4xf32>
    %95 = tpu.concatenate %80, %94 in 1 : vector<6x4xf32>, vector<6x4xf32> -> vector<6x8xf32>
    %c0_33 = arith.constant 0 : index
    %c0_34 = arith.constant 0 : index
    %c0_35 = arith.constant 0 : index
    %96 = vector.load %arg6[%c0_33, %c0_34, %c0_35] : memref<3x8x8xf32, #tpu.memory_space<vmem>>, vector<1x8x8xf32>
    %97 = vector.shape_cast %96 : vector<1x8x8xf32> to vector<8x8xf32>
    %cst_36 = arith.constant dense<0.000000e+00> : vector<6x8xf32>
    %98 = tpu.matmul %95, %97, %cst_36 {dimension_numbers = #tpu.dot_dimension_numbers<[1], [0], [0], [1], [0, 0, 1, 1], [], []>} : vector<6x8xf32>, vector<8x8xf32>, vector<6x8xf32> -> vector<6x8xf32>
    %99 = vector.broadcast %55 : vector<1x8xf32> to vector<6x8xf32>
    %100 = arith.addf %98, %99 : vector<6x8xf32>
    %c0_37 = arith.constant 0 : index
    %c0_38 = arith.constant 0 : index
    %c0_39 = arith.constant 0 : index
    %101 = vector.load %arg7[%c0_37, %c0_38, %c0_39] : memref<3x64x8xf32, #tpu.memory_space<vmem>>, vector<1x64x8xf32>
    %102 = vector.shape_cast %101 : vector<1x64x8xf32> to vector<64x8xf32>
    %103 = vector.extract_strided_slice %102 {offsets = [0, 0], sizes = [32, 8], strides = [1, 1]} : vector<64x8xf32> to vector<32x8xf32>
    %104 = vector.extract_strided_slice %102 {offsets = [32, 0], sizes = [32, 8], strides = [1, 1]} : vector<64x8xf32> to vector<32x8xf32>
    %cst_40 = arith.constant 0.000000e+00 : f32
    %105 = vector.broadcast %cst_40 : f32 to vector<3x8xf32>
    %106 = tpu.concatenate %105, %100 in 0 : vector<3x8xf32>, vector<6x8xf32> -> vector<9x8xf32>
    %107 = vector.extract_strided_slice %106 {offsets = [0, 0], sizes = [6, 8], strides = [1, 1]} : vector<9x8xf32> to vector<6x8xf32>
    %108 = vector.extract_strided_slice %106 {offsets = [1, 0], sizes = [6, 8], strides = [1, 1]} : vector<9x8xf32> to vector<6x8xf32>
    %109 = vector.extract_strided_slice %106 {offsets = [2, 0], sizes = [6, 8], strides = [1, 1]} : vector<9x8xf32> to vector<6x8xf32>
    %110 = vector.extract_strided_slice %106 {offsets = [3, 0], sizes = [6, 8], strides = [1, 1]} : vector<9x8xf32> to vector<6x8xf32>
    %111 = tpu.concatenate %107, %108, %109, %110 in 1 : vector<6x8xf32>, vector<6x8xf32>, vector<6x8xf32>, vector<6x8xf32> -> vector<6x32xf32>
    %cst_41 = arith.constant dense<0.000000e+00> : vector<6x8xf32>
    %112 = tpu.matmul %111, %103, %cst_41 {dimension_numbers = #tpu.dot_dimension_numbers<[1], [0], [0], [1], [0, 0, 1, 1], [], []>} : vector<6x32xf32>, vector<32x8xf32>, vector<6x8xf32> -> vector<6x8xf32>
    %113 = vector.broadcast %56 : vector<1x8xf32> to vector<6x8xf32>
    %114 = arith.addf %112, %113 : vector<6x8xf32>
    %cst_42 = arith.constant 0.000000e+00 : f32
    %115 = vector.broadcast %cst_42 : f32 to vector<6x8xf32>
    %116 = arith.cmpf ogt, %114, %115 : vector<6x8xf32>
    %cst_43 = arith.constant 0.000000e+00 : f32
    %117 = vector.broadcast %cst_43 : f32 to vector<6x8xf32>
    %118 = arith.minimumf %114, %117 : vector<6x8xf32>
    %119 = math.exp %118 : vector<6x8xf32>
    %cst_44 = arith.constant 1.000000e+00 : f32
    %120 = vector.broadcast %cst_44 : f32 to vector<6x8xf32>
    %121 = arith.subf %119, %120 : vector<6x8xf32>
    %122 = arith.select %116, %114, %121 : vector<6x8xi1>, vector<6x8xf32>
    %cst_45 = arith.constant 0.000000e+00 : f32
    %123 = vector.broadcast %cst_45 : f32 to vector<3x8xf32>
    %124 = tpu.concatenate %123, %122 in 0 : vector<3x8xf32>, vector<6x8xf32> -> vector<9x8xf32>
    %125 = vector.extract_strided_slice %124 {offsets = [0, 0], sizes = [6, 8], strides = [1, 1]} : vector<9x8xf32> to vector<6x8xf32>
    %126 = vector.extract_strided_slice %124 {offsets = [1, 0], sizes = [6, 8], strides = [1, 1]} : vector<9x8xf32> to vector<6x8xf32>
    %127 = vector.extract_strided_slice %124 {offsets = [2, 0], sizes = [6, 8], strides = [1, 1]} : vector<9x8xf32> to vector<6x8xf32>
    %128 = vector.extract_strided_slice %124 {offsets = [3, 0], sizes = [6, 8], strides = [1, 1]} : vector<9x8xf32> to vector<6x8xf32>
    %129 = tpu.concatenate %125, %126, %127, %128 in 1 : vector<6x8xf32>, vector<6x8xf32>, vector<6x8xf32>, vector<6x8xf32> -> vector<6x32xf32>
    %cst_46 = arith.constant dense<0.000000e+00> : vector<6x8xf32>
    %130 = tpu.matmul %129, %104, %cst_46 {dimension_numbers = #tpu.dot_dimension_numbers<[1], [0], [0], [1], [0, 0, 1, 1], [], []>} : vector<6x32xf32>, vector<32x8xf32>, vector<6x8xf32> -> vector<6x8xf32>
    %131 = vector.broadcast %57 : vector<1x8xf32> to vector<6x8xf32>
    %132 = arith.addf %130, %131 : vector<6x8xf32>
    %cst_47 = arith.constant 0.000000e+00 : f32
    %133 = vector.broadcast %cst_47 : f32 to vector<6x8xf32>
    %134 = arith.cmpf ogt, %132, %133 : vector<6x8xf32>
    %cst_48 = arith.constant 0.000000e+00 : f32
    %135 = vector.broadcast %cst_48 : f32 to vector<6x8xf32>
    %136 = arith.minimumf %132, %135 : vector<6x8xf32>
    %137 = math.exp %136 : vector<6x8xf32>
    %cst_49 = arith.constant 1.000000e+00 : f32
    %138 = vector.broadcast %cst_49 : f32 to vector<6x8xf32>
    %139 = arith.subf %137, %138 : vector<6x8xf32>
    %140 = arith.select %134, %132, %139 : vector<6x8xi1>, vector<6x8xf32>
    %141 = arith.addf %140, %100 : vector<6x8xf32>
    %cst_50 = arith.constant 0.000000e+00 : f32
    %142 = vector.broadcast %cst_50 : f32 to vector<6x8xf32>
    %143 = arith.cmpf ogt, %141, %142 : vector<6x8xf32>
    %cst_51 = arith.constant 0.000000e+00 : f32
    %144 = vector.broadcast %cst_51 : f32 to vector<6x8xf32>
    %145 = arith.minimumf %141, %144 : vector<6x8xf32>
    %146 = math.exp %145 : vector<6x8xf32>
    %cst_52 = arith.constant 1.000000e+00 : f32
    %147 = vector.broadcast %cst_52 : f32 to vector<6x8xf32>
    %148 = arith.subf %146, %147 : vector<6x8xf32>
    %149 = arith.select %143, %141, %148 : vector<6x8xi1>, vector<6x8xf32>
    %150 = vector.extract_strided_slice %149 {offsets = [5, 0], sizes = [1, 8], strides = [1, 1]} : vector<6x8xf32> to vector<1x8xf32>
    %c0_53 = arith.constant 0 : index
    %c0_54 = arith.constant 0 : index
    %c0_55 = arith.constant 0 : index
    %151 = vector.load %arg8[%c0_53, %c0_54, %c0_55] : memref<3x8x4xf32, #tpu.memory_space<vmem>>, vector<1x8x4xf32>
    %152 = vector.shape_cast %151 : vector<1x8x4xf32> to vector<8x4xf32>
    %cst_56 = arith.constant dense<0.000000e+00> : vector<1x4xf32>
    %153 = tpu.matmul %150, %152, %cst_56 {dimension_numbers = #tpu.dot_dimension_numbers<[1], [0], [0], [1], [0, 0, 1, 1], [], []>} : vector<1x8xf32>, vector<8x4xf32>, vector<1x4xf32> -> vector<1x4xf32>
    %154 = arith.addf %50, %153 : vector<1x4xf32>
    %155 = arith.addf %154, %58 : vector<1x4xf32>
    %156 = vector.extract_strided_slice %49 {offsets = [1, 0], sizes = [6, 8], strides = [1, 1]} : vector<8x8xf32> to vector<6x8xf32>
    %c1 = arith.constant 1 : index
    %c0_57 = arith.constant 0 : index
    %c0_58 = arith.constant 0 : index
    %157 = vector.load %arg9[%c1, %c0_57, %c0_58] : memref<3x8x24xf32, #tpu.memory_space<vmem>>, vector<1x8x24xf32>
    %158 = vector.shape_cast %157 : vector<1x8x24xf32> to vector<8x24xf32>
    %159 = vector.extract_strided_slice %158 {offsets = [0, 0], sizes = [1, 24], strides = [1, 1]} : vector<8x24xf32> to vector<1x24xf32>
    %160 = vector.extract_strided_slice %158 {offsets = [1, 0], sizes = [1, 8], strides = [1, 1]} : vector<8x24xf32> to vector<1x8xf32>
    %161 = vector.extract_strided_slice %158 {offsets = [2, 0], sizes = [1, 8], strides = [1, 1]} : vector<8x24xf32> to vector<1x8xf32>
    %162 = vector.extract_strided_slice %158 {offsets = [3, 0], sizes = [1, 8], strides = [1, 1]} : vector<8x24xf32> to vector<1x8xf32>
    %163 = vector.extract_strided_slice %158 {offsets = [4, 0], sizes = [1, 4], strides = [1, 1]} : vector<8x24xf32> to vector<1x4xf32>
    %c1_59 = arith.constant 1 : index
    %c0_60 = arith.constant 0 : index
    %c0_61 = arith.constant 0 : index
    %164 = vector.load %arg5[%c1_59, %c0_60, %c0_61] : memref<3x8x24xf32, #tpu.memory_space<vmem>>, vector<1x8x24xf32>
    %165 = vector.shape_cast %164 : vector<1x8x24xf32> to vector<8x24xf32>
    %cst_62 = arith.constant dense<0.000000e+00> : vector<6x24xf32>
    %166 = tpu.matmul %156, %165, %cst_62 {dimension_numbers = #tpu.dot_dimension_numbers<[1], [0], [0], [1], [0, 0, 1, 1], [], []>} : vector<6x8xf32>, vector<8x24xf32>, vector<6x24xf32> -> vector<6x24xf32>
    %167 = vector.broadcast %159 : vector<1x24xf32> to vector<6x24xf32>
    %168 = arith.addf %166, %167 : vector<6x24xf32>
    %169 = vector.extract_strided_slice %168 {offsets = [0, 0], sizes = [6, 8], strides = [1, 1]} : vector<6x24xf32> to vector<6x8xf32>
    %170 = vector.extract_strided_slice %168 {offsets = [0, 8], sizes = [6, 8], strides = [1, 1]} : vector<6x24xf32> to vector<6x8xf32>
    %171 = vector.extract_strided_slice %168 {offsets = [0, 16], sizes = [6, 8], strides = [1, 1]} : vector<6x24xf32> to vector<6x8xf32>
    %172 = vector.extract_strided_slice %169 {offsets = [0, 0], sizes = [6, 4], strides = [1, 1]} : vector<6x8xf32> to vector<6x4xf32>
    %173 = vector.extract_strided_slice %170 {offsets = [0, 0], sizes = [6, 4], strides = [1, 1]} : vector<6x8xf32> to vector<6x4xf32>
    %174 = vector.extract_strided_slice %171 {offsets = [0, 0], sizes = [6, 4], strides = [1, 1]} : vector<6x8xf32> to vector<6x4xf32>
    %cst_63 = arith.constant dense<0.000000e+00> : vector<6x6xf32>
    %175 = tpu.matmul %172, %173, %cst_63 {dimension_numbers = #tpu.dot_dimension_numbers<[1], [1], [0], [0], [0, 0, 1, 0], [], []>} : vector<6x4xf32>, vector<6x4xf32>, vector<6x6xf32> -> vector<6x6xf32>
    %cst_64 = arith.constant dense<0xFF800000> : vector<6xf32>
    %176 = vector.multi_reduction <maximumf>, %175, %cst_64 [1] : vector<6x6xf32> to vector<6xf32>
    %177 = vector.shape_cast %176 : vector<6xf32> to vector<6x1xf32>
    %178 = vector.broadcast %177 : vector<6x1xf32> to vector<6x6xf32>
    %179 = arith.subf %175, %178 : vector<6x6xf32>
    %180 = math.exp %179 : vector<6x6xf32>
    %cst_65 = arith.constant dense<0.000000e+00> : vector<6xf32>
    %181 = vector.multi_reduction <add>, %180, %cst_65 [1] : vector<6x6xf32> to vector<6xf32>
    %182 = vector.shape_cast %181 : vector<6xf32> to vector<6x1xf32>
    %183 = vector.broadcast %182 : vector<6x1xf32> to vector<6x6xf32>
    %184 = arith.divf %180, %183 : vector<6x6xf32>
    %cst_66 = arith.constant dense<0.000000e+00> : vector<6x4xf32>
    %185 = tpu.matmul %184, %174, %cst_66 {dimension_numbers = #tpu.dot_dimension_numbers<[1], [0], [0], [1], [0, 0, 1, 1], [], []>} : vector<6x6xf32>, vector<6x4xf32>, vector<6x4xf32> -> vector<6x4xf32>
    %186 = vector.extract_strided_slice %169 {offsets = [0, 4], sizes = [6, 4], strides = [1, 1]} : vector<6x8xf32> to vector<6x4xf32>
    %187 = vector.extract_strided_slice %170 {offsets = [0, 4], sizes = [6, 4], strides = [1, 1]} : vector<6x8xf32> to vector<6x4xf32>
    %188 = vector.extract_strided_slice %171 {offsets = [0, 4], sizes = [6, 4], strides = [1, 1]} : vector<6x8xf32> to vector<6x4xf32>
    %cst_67 = arith.constant dense<0.000000e+00> : vector<6x6xf32>
    %189 = tpu.matmul %186, %187, %cst_67 {dimension_numbers = #tpu.dot_dimension_numbers<[1], [1], [0], [0], [0, 0, 1, 0], [], []>} : vector<6x4xf32>, vector<6x4xf32>, vector<6x6xf32> -> vector<6x6xf32>
    %cst_68 = arith.constant dense<0xFF800000> : vector<6xf32>
    %190 = vector.multi_reduction <maximumf>, %189, %cst_68 [1] : vector<6x6xf32> to vector<6xf32>
    %191 = vector.shape_cast %190 : vector<6xf32> to vector<6x1xf32>
    %192 = vector.broadcast %191 : vector<6x1xf32> to vector<6x6xf32>
    %193 = arith.subf %189, %192 : vector<6x6xf32>
    %194 = math.exp %193 : vector<6x6xf32>
    %cst_69 = arith.constant dense<0.000000e+00> : vector<6xf32>
    %195 = vector.multi_reduction <add>, %194, %cst_69 [1] : vector<6x6xf32> to vector<6xf32>
    %196 = vector.shape_cast %195 : vector<6xf32> to vector<6x1xf32>
    %197 = vector.broadcast %196 : vector<6x1xf32> to vector<6x6xf32>
    %198 = arith.divf %194, %197 : vector<6x6xf32>
    %cst_70 = arith.constant dense<0.000000e+00> : vector<6x4xf32>
    %199 = tpu.matmul %198, %188, %cst_70 {dimension_numbers = #tpu.dot_dimension_numbers<[1], [0], [0], [1], [0, 0, 1, 1], [], []>} : vector<6x6xf32>, vector<6x4xf32>, vector<6x4xf32> -> vector<6x4xf32>
    %200 = tpu.concatenate %185, %199 in 1 : vector<6x4xf32>, vector<6x4xf32> -> vector<6x8xf32>
    %c1_71 = arith.constant 1 : index
    %c0_72 = arith.constant 0 : index
    %c0_73 = arith.constant 0 : index
    %201 = vector.load %arg6[%c1_71, %c0_72, %c0_73] : memref<3x8x8xf32, #tpu.memory_space<vmem>>, vector<1x8x8xf32>
    %202 = vector.shape_cast %201 : vector<1x8x8xf32> to vector<8x8xf32>
    %cst_74 = arith.constant dense<0.000000e+00> : vector<6x8xf32>
    %203 = tpu.matmul %200, %202, %cst_74 {dimension_numbers = #tpu.dot_dimension_numbers<[1], [0], [0], [1], [0, 0, 1, 1], [], []>} : vector<6x8xf32>, vector<8x8xf32>, vector<6x8xf32> -> vector<6x8xf32>
    %204 = vector.broadcast %160 : vector<1x8xf32> to vector<6x8xf32>
    %205 = arith.addf %203, %204 : vector<6x8xf32>
    %c1_75 = arith.constant 1 : index
    %c0_76 = arith.constant 0 : index
    %c0_77 = arith.constant 0 : index
    %206 = vector.load %arg7[%c1_75, %c0_76, %c0_77] : memref<3x64x8xf32, #tpu.memory_space<vmem>>, vector<1x64x8xf32>
    %207 = vector.shape_cast %206 : vector<1x64x8xf32> to vector<64x8xf32>
    %208 = vector.extract_strided_slice %207 {offsets = [0, 0], sizes = [32, 8], strides = [1, 1]} : vector<64x8xf32> to vector<32x8xf32>
    %209 = vector.extract_strided_slice %207 {offsets = [32, 0], sizes = [32, 8], strides = [1, 1]} : vector<64x8xf32> to vector<32x8xf32>
    %cst_78 = arith.constant 0.000000e+00 : f32
    %210 = vector.broadcast %cst_78 : f32 to vector<3x8xf32>
    %211 = tpu.concatenate %210, %205 in 0 : vector<3x8xf32>, vector<6x8xf32> -> vector<9x8xf32>
    %212 = vector.extract_strided_slice %211 {offsets = [0, 0], sizes = [6, 8], strides = [1, 1]} : vector<9x8xf32> to vector<6x8xf32>
    %213 = vector.extract_strided_slice %211 {offsets = [1, 0], sizes = [6, 8], strides = [1, 1]} : vector<9x8xf32> to vector<6x8xf32>
    %214 = vector.extract_strided_slice %211 {offsets = [2, 0], sizes = [6, 8], strides = [1, 1]} : vector<9x8xf32> to vector<6x8xf32>
    %215 = vector.extract_strided_slice %211 {offsets = [3, 0], sizes = [6, 8], strides = [1, 1]} : vector<9x8xf32> to vector<6x8xf32>
    %216 = tpu.concatenate %212, %213, %214, %215 in 1 : vector<6x8xf32>, vector<6x8xf32>, vector<6x8xf32>, vector<6x8xf32> -> vector<6x32xf32>
    %cst_79 = arith.constant dense<0.000000e+00> : vector<6x8xf32>
    %217 = tpu.matmul %216, %208, %cst_79 {dimension_numbers = #tpu.dot_dimension_numbers<[1], [0], [0], [1], [0, 0, 1, 1], [], []>} : vector<6x32xf32>, vector<32x8xf32>, vector<6x8xf32> -> vector<6x8xf32>
    %218 = vector.broadcast %161 : vector<1x8xf32> to vector<6x8xf32>
    %219 = arith.addf %217, %218 : vector<6x8xf32>
    %cst_80 = arith.constant 0.000000e+00 : f32
    %220 = vector.broadcast %cst_80 : f32 to vector<6x8xf32>
    %221 = arith.cmpf ogt, %219, %220 : vector<6x8xf32>
    %cst_81 = arith.constant 0.000000e+00 : f32
    %222 = vector.broadcast %cst_81 : f32 to vector<6x8xf32>
    %223 = arith.minimumf %219, %222 : vector<6x8xf32>
    %224 = math.exp %223 : vector<6x8xf32>
    %cst_82 = arith.constant 1.000000e+00 : f32
    %225 = vector.broadcast %cst_82 : f32 to vector<6x8xf32>
    %226 = arith.subf %224, %225 : vector<6x8xf32>
    %227 = arith.select %221, %219, %226 : vector<6x8xi1>, vector<6x8xf32>
    %cst_83 = arith.constant 0.000000e+00 : f32
    %228 = vector.broadcast %cst_83 : f32 to vector<3x8xf32>
    %229 = tpu.concatenate %228, %227 in 0 : vector<3x8xf32>, vector<6x8xf32> -> vector<9x8xf32>
    %230 = vector.extract_strided_slice %229 {offsets = [0, 0], sizes = [6, 8], strides = [1, 1]} : vector<9x8xf32> to vector<6x8xf32>
    %231 = vector.extract_strided_slice %229 {offsets = [1, 0], sizes = [6, 8], strides = [1, 1]} : vector<9x8xf32> to vector<6x8xf32>
    %232 = vector.extract_strided_slice %229 {offsets = [2, 0], sizes = [6, 8], strides = [1, 1]} : vector<9x8xf32> to vector<6x8xf32>
    %233 = vector.extract_strided_slice %229 {offsets = [3, 0], sizes = [6, 8], strides = [1, 1]} : vector<9x8xf32> to vector<6x8xf32>
    %234 = tpu.concatenate %230, %231, %232, %233 in 1 : vector<6x8xf32>, vector<6x8xf32>, vector<6x8xf32>, vector<6x8xf32> -> vector<6x32xf32>
    %cst_84 = arith.constant dense<0.000000e+00> : vector<6x8xf32>
    %235 = tpu.matmul %234, %209, %cst_84 {dimension_numbers = #tpu.dot_dimension_numbers<[1], [0], [0], [1], [0, 0, 1, 1], [], []>} : vector<6x32xf32>, vector<32x8xf32>, vector<6x8xf32> -> vector<6x8xf32>
    %236 = vector.broadcast %162 : vector<1x8xf32> to vector<6x8xf32>
    %237 = arith.addf %235, %236 : vector<6x8xf32>
    %cst_85 = arith.constant 0.000000e+00 : f32
    %238 = vector.broadcast %cst_85 : f32 to vector<6x8xf32>
    %239 = arith.cmpf ogt, %237, %238 : vector<6x8xf32>
    %cst_86 = arith.constant 0.000000e+00 : f32
    %240 = vector.broadcast %cst_86 : f32 to vector<6x8xf32>
    %241 = arith.minimumf %237, %240 : vector<6x8xf32>
    %242 = math.exp %241 : vector<6x8xf32>
    %cst_87 = arith.constant 1.000000e+00 : f32
    %243 = vector.broadcast %cst_87 : f32 to vector<6x8xf32>
    %244 = arith.subf %242, %243 : vector<6x8xf32>
    %245 = arith.select %239, %237, %244 : vector<6x8xi1>, vector<6x8xf32>
    %246 = arith.addf %245, %205 : vector<6x8xf32>
    %cst_88 = arith.constant 0.000000e+00 : f32
    %247 = vector.broadcast %cst_88 : f32 to vector<6x8xf32>
    %248 = arith.cmpf ogt, %246, %247 : vector<6x8xf32>
    %cst_89 = arith.constant 0.000000e+00 : f32
    %249 = vector.broadcast %cst_89 : f32 to vector<6x8xf32>
    %250 = arith.minimumf %246, %249 : vector<6x8xf32>
    %251 = math.exp %250 : vector<6x8xf32>
    %cst_90 = arith.constant 1.000000e+00 : f32
    %252 = vector.broadcast %cst_90 : f32 to vector<6x8xf32>
    %253 = arith.subf %251, %252 : vector<6x8xf32>
    %254 = arith.select %248, %246, %253 : vector<6x8xi1>, vector<6x8xf32>
    %255 = vector.extract_strided_slice %254 {offsets = [5, 0], sizes = [1, 8], strides = [1, 1]} : vector<6x8xf32> to vector<1x8xf32>
    %c1_91 = arith.constant 1 : index
    %c0_92 = arith.constant 0 : index
    %c0_93 = arith.constant 0 : index
    %256 = vector.load %arg8[%c1_91, %c0_92, %c0_93] : memref<3x8x4xf32, #tpu.memory_space<vmem>>, vector<1x8x4xf32>
    %257 = vector.shape_cast %256 : vector<1x8x4xf32> to vector<8x4xf32>
    %cst_94 = arith.constant dense<0.000000e+00> : vector<1x4xf32>
    %258 = tpu.matmul %255, %257, %cst_94 {dimension_numbers = #tpu.dot_dimension_numbers<[1], [0], [0], [1], [0, 0, 1, 1], [], []>} : vector<1x8xf32>, vector<8x4xf32>, vector<1x4xf32> -> vector<1x4xf32>
    %259 = arith.addf %155, %258 : vector<1x4xf32>
    %260 = arith.addf %259, %163 : vector<1x4xf32>
    %261 = vector.extract_strided_slice %49 {offsets = [2, 0], sizes = [6, 8], strides = [1, 1]} : vector<8x8xf32> to vector<6x8xf32>
    %c2 = arith.constant 2 : index
    %c0_95 = arith.constant 0 : index
    %c0_96 = arith.constant 0 : index
    %262 = vector.load %arg9[%c2, %c0_95, %c0_96] : memref<3x8x24xf32, #tpu.memory_space<vmem>>, vector<1x8x24xf32>
    %263 = vector.shape_cast %262 : vector<1x8x24xf32> to vector<8x24xf32>
    %264 = vector.extract_strided_slice %263 {offsets = [0, 0], sizes = [1, 24], strides = [1, 1]} : vector<8x24xf32> to vector<1x24xf32>
    %265 = vector.extract_strided_slice %263 {offsets = [1, 0], sizes = [1, 8], strides = [1, 1]} : vector<8x24xf32> to vector<1x8xf32>
    %266 = vector.extract_strided_slice %263 {offsets = [2, 0], sizes = [1, 8], strides = [1, 1]} : vector<8x24xf32> to vector<1x8xf32>
    %267 = vector.extract_strided_slice %263 {offsets = [3, 0], sizes = [1, 8], strides = [1, 1]} : vector<8x24xf32> to vector<1x8xf32>
    %268 = vector.extract_strided_slice %263 {offsets = [4, 0], sizes = [1, 4], strides = [1, 1]} : vector<8x24xf32> to vector<1x4xf32>
    %c2_97 = arith.constant 2 : index
    %c0_98 = arith.constant 0 : index
    %c0_99 = arith.constant 0 : index
    %269 = vector.load %arg5[%c2_97, %c0_98, %c0_99] : memref<3x8x24xf32, #tpu.memory_space<vmem>>, vector<1x8x24xf32>
    %270 = vector.shape_cast %269 : vector<1x8x24xf32> to vector<8x24xf32>
    %cst_100 = arith.constant dense<0.000000e+00> : vector<6x24xf32>
    %271 = tpu.matmul %261, %270, %cst_100 {dimension_numbers = #tpu.dot_dimension_numbers<[1], [0], [0], [1], [0, 0, 1, 1], [], []>} : vector<6x8xf32>, vector<8x24xf32>, vector<6x24xf32> -> vector<6x24xf32>
    %272 = vector.broadcast %264 : vector<1x24xf32> to vector<6x24xf32>
    %273 = arith.addf %271, %272 : vector<6x24xf32>
    %274 = vector.extract_strided_slice %273 {offsets = [0, 0], sizes = [6, 8], strides = [1, 1]} : vector<6x24xf32> to vector<6x8xf32>
    %275 = vector.extract_strided_slice %273 {offsets = [0, 8], sizes = [6, 8], strides = [1, 1]} : vector<6x24xf32> to vector<6x8xf32>
    %276 = vector.extract_strided_slice %273 {offsets = [0, 16], sizes = [6, 8], strides = [1, 1]} : vector<6x24xf32> to vector<6x8xf32>
    %277 = vector.extract_strided_slice %274 {offsets = [0, 0], sizes = [6, 4], strides = [1, 1]} : vector<6x8xf32> to vector<6x4xf32>
    %278 = vector.extract_strided_slice %275 {offsets = [0, 0], sizes = [6, 4], strides = [1, 1]} : vector<6x8xf32> to vector<6x4xf32>
    %279 = vector.extract_strided_slice %276 {offsets = [0, 0], sizes = [6, 4], strides = [1, 1]} : vector<6x8xf32> to vector<6x4xf32>
    %cst_101 = arith.constant dense<0.000000e+00> : vector<6x6xf32>
    %280 = tpu.matmul %277, %278, %cst_101 {dimension_numbers = #tpu.dot_dimension_numbers<[1], [1], [0], [0], [0, 0, 1, 0], [], []>} : vector<6x4xf32>, vector<6x4xf32>, vector<6x6xf32> -> vector<6x6xf32>
    %cst_102 = arith.constant dense<0xFF800000> : vector<6xf32>
    %281 = vector.multi_reduction <maximumf>, %280, %cst_102 [1] : vector<6x6xf32> to vector<6xf32>
    %282 = vector.shape_cast %281 : vector<6xf32> to vector<6x1xf32>
    %283 = vector.broadcast %282 : vector<6x1xf32> to vector<6x6xf32>
    %284 = arith.subf %280, %283 : vector<6x6xf32>
    %285 = math.exp %284 : vector<6x6xf32>
    %cst_103 = arith.constant dense<0.000000e+00> : vector<6xf32>
    %286 = vector.multi_reduction <add>, %285, %cst_103 [1] : vector<6x6xf32> to vector<6xf32>
    %287 = vector.shape_cast %286 : vector<6xf32> to vector<6x1xf32>
    %288 = vector.broadcast %287 : vector<6x1xf32> to vector<6x6xf32>
    %289 = arith.divf %285, %288 : vector<6x6xf32>
    %cst_104 = arith.constant dense<0.000000e+00> : vector<6x4xf32>
    %290 = tpu.matmul %289, %279, %cst_104 {dimension_numbers = #tpu.dot_dimension_numbers<[1], [0], [0], [1], [0, 0, 1, 1], [], []>} : vector<6x6xf32>, vector<6x4xf32>, vector<6x4xf32> -> vector<6x4xf32>
    %291 = vector.extract_strided_slice %274 {offsets = [0, 4], sizes = [6, 4], strides = [1, 1]} : vector<6x8xf32> to vector<6x4xf32>
    %292 = vector.extract_strided_slice %275 {offsets = [0, 4], sizes = [6, 4], strides = [1, 1]} : vector<6x8xf32> to vector<6x4xf32>
    %293 = vector.extract_strided_slice %276 {offsets = [0, 4], sizes = [6, 4], strides = [1, 1]} : vector<6x8xf32> to vector<6x4xf32>
    %cst_105 = arith.constant dense<0.000000e+00> : vector<6x6xf32>
    %294 = tpu.matmul %291, %292, %cst_105 {dimension_numbers = #tpu.dot_dimension_numbers<[1], [1], [0], [0], [0, 0, 1, 0], [], []>} : vector<6x4xf32>, vector<6x4xf32>, vector<6x6xf32> -> vector<6x6xf32>
    %cst_106 = arith.constant dense<0xFF800000> : vector<6xf32>
    %295 = vector.multi_reduction <maximumf>, %294, %cst_106 [1] : vector<6x6xf32> to vector<6xf32>
    %296 = vector.shape_cast %295 : vector<6xf32> to vector<6x1xf32>
    %297 = vector.broadcast %296 : vector<6x1xf32> to vector<6x6xf32>
    %298 = arith.subf %294, %297 : vector<6x6xf32>
    %299 = math.exp %298 : vector<6x6xf32>
    %cst_107 = arith.constant dense<0.000000e+00> : vector<6xf32>
    %300 = vector.multi_reduction <add>, %299, %cst_107 [1] : vector<6x6xf32> to vector<6xf32>
    %301 = vector.shape_cast %300 : vector<6xf32> to vector<6x1xf32>
    %302 = vector.broadcast %301 : vector<6x1xf32> to vector<6x6xf32>
    %303 = arith.divf %299, %302 : vector<6x6xf32>
    %cst_108 = arith.constant dense<0.000000e+00> : vector<6x4xf32>
    %304 = tpu.matmul %303, %293, %cst_108 {dimension_numbers = #tpu.dot_dimension_numbers<[1], [0], [0], [1], [0, 0, 1, 1], [], []>} : vector<6x6xf32>, vector<6x4xf32>, vector<6x4xf32> -> vector<6x4xf32>
    %305 = tpu.concatenate %290, %304 in 1 : vector<6x4xf32>, vector<6x4xf32> -> vector<6x8xf32>
    %c2_109 = arith.constant 2 : index
    %c0_110 = arith.constant 0 : index
    %c0_111 = arith.constant 0 : index
    %306 = vector.load %arg6[%c2_109, %c0_110, %c0_111] : memref<3x8x8xf32, #tpu.memory_space<vmem>>, vector<1x8x8xf32>
    %307 = vector.shape_cast %306 : vector<1x8x8xf32> to vector<8x8xf32>
    %cst_112 = arith.constant dense<0.000000e+00> : vector<6x8xf32>
    %308 = tpu.matmul %305, %307, %cst_112 {dimension_numbers = #tpu.dot_dimension_numbers<[1], [0], [0], [1], [0, 0, 1, 1], [], []>} : vector<6x8xf32>, vector<8x8xf32>, vector<6x8xf32> -> vector<6x8xf32>
    %309 = vector.broadcast %265 : vector<1x8xf32> to vector<6x8xf32>
    %310 = arith.addf %308, %309 : vector<6x8xf32>
    %c2_113 = arith.constant 2 : index
    %c0_114 = arith.constant 0 : index
    %c0_115 = arith.constant 0 : index
    %311 = vector.load %arg7[%c2_113, %c0_114, %c0_115] : memref<3x64x8xf32, #tpu.memory_space<vmem>>, vector<1x64x8xf32>
    %312 = vector.shape_cast %311 : vector<1x64x8xf32> to vector<64x8xf32>
    %313 = vector.extract_strided_slice %312 {offsets = [0, 0], sizes = [32, 8], strides = [1, 1]} : vector<64x8xf32> to vector<32x8xf32>
    %314 = vector.extract_strided_slice %312 {offsets = [32, 0], sizes = [32, 8], strides = [1, 1]} : vector<64x8xf32> to vector<32x8xf32>
    %cst_116 = arith.constant 0.000000e+00 : f32
    %315 = vector.broadcast %cst_116 : f32 to vector<3x8xf32>
    %316 = tpu.concatenate %315, %310 in 0 : vector<3x8xf32>, vector<6x8xf32> -> vector<9x8xf32>
    %317 = vector.extract_strided_slice %316 {offsets = [0, 0], sizes = [6, 8], strides = [1, 1]} : vector<9x8xf32> to vector<6x8xf32>
    %318 = vector.extract_strided_slice %316 {offsets = [1, 0], sizes = [6, 8], strides = [1, 1]} : vector<9x8xf32> to vector<6x8xf32>
    %319 = vector.extract_strided_slice %316 {offsets = [2, 0], sizes = [6, 8], strides = [1, 1]} : vector<9x8xf32> to vector<6x8xf32>
    %320 = vector.extract_strided_slice %316 {offsets = [3, 0], sizes = [6, 8], strides = [1, 1]} : vector<9x8xf32> to vector<6x8xf32>
    %321 = tpu.concatenate %317, %318, %319, %320 in 1 : vector<6x8xf32>, vector<6x8xf32>, vector<6x8xf32>, vector<6x8xf32> -> vector<6x32xf32>
    %cst_117 = arith.constant dense<0.000000e+00> : vector<6x8xf32>
    %322 = tpu.matmul %321, %313, %cst_117 {dimension_numbers = #tpu.dot_dimension_numbers<[1], [0], [0], [1], [0, 0, 1, 1], [], []>} : vector<6x32xf32>, vector<32x8xf32>, vector<6x8xf32> -> vector<6x8xf32>
    %323 = vector.broadcast %266 : vector<1x8xf32> to vector<6x8xf32>
    %324 = arith.addf %322, %323 : vector<6x8xf32>
    %cst_118 = arith.constant 0.000000e+00 : f32
    %325 = vector.broadcast %cst_118 : f32 to vector<6x8xf32>
    %326 = arith.cmpf ogt, %324, %325 : vector<6x8xf32>
    %cst_119 = arith.constant 0.000000e+00 : f32
    %327 = vector.broadcast %cst_119 : f32 to vector<6x8xf32>
    %328 = arith.minimumf %324, %327 : vector<6x8xf32>
    %329 = math.exp %328 : vector<6x8xf32>
    %cst_120 = arith.constant 1.000000e+00 : f32
    %330 = vector.broadcast %cst_120 : f32 to vector<6x8xf32>
    %331 = arith.subf %329, %330 : vector<6x8xf32>
    %332 = arith.select %326, %324, %331 : vector<6x8xi1>, vector<6x8xf32>
    %cst_121 = arith.constant 0.000000e+00 : f32
    %333 = vector.broadcast %cst_121 : f32 to vector<3x8xf32>
    %334 = tpu.concatenate %333, %332 in 0 : vector<3x8xf32>, vector<6x8xf32> -> vector<9x8xf32>
    %335 = vector.extract_strided_slice %334 {offsets = [0, 0], sizes = [6, 8], strides = [1, 1]} : vector<9x8xf32> to vector<6x8xf32>
    %336 = vector.extract_strided_slice %334 {offsets = [1, 0], sizes = [6, 8], strides = [1, 1]} : vector<9x8xf32> to vector<6x8xf32>
    %337 = vector.extract_strided_slice %334 {offsets = [2, 0], sizes = [6, 8], strides = [1, 1]} : vector<9x8xf32> to vector<6x8xf32>
    %338 = vector.extract_strided_slice %334 {offsets = [3, 0], sizes = [6, 8], strides = [1, 1]} : vector<9x8xf32> to vector<6x8xf32>
    %339 = tpu.concatenate %335, %336, %337, %338 in 1 : vector<6x8xf32>, vector<6x8xf32>, vector<6x8xf32>, vector<6x8xf32> -> vector<6x32xf32>
    %cst_122 = arith.constant dense<0.000000e+00> : vector<6x8xf32>
    %340 = tpu.matmul %339, %314, %cst_122 {dimension_numbers = #tpu.dot_dimension_numbers<[1], [0], [0], [1], [0, 0, 1, 1], [], []>} : vector<6x32xf32>, vector<32x8xf32>, vector<6x8xf32> -> vector<6x8xf32>
    %341 = vector.broadcast %267 : vector<1x8xf32> to vector<6x8xf32>
    %342 = arith.addf %340, %341 : vector<6x8xf32>
    %cst_123 = arith.constant 0.000000e+00 : f32
    %343 = vector.broadcast %cst_123 : f32 to vector<6x8xf32>
    %344 = arith.cmpf ogt, %342, %343 : vector<6x8xf32>
    %cst_124 = arith.constant 0.000000e+00 : f32
    %345 = vector.broadcast %cst_124 : f32 to vector<6x8xf32>
    %346 = arith.minimumf %342, %345 : vector<6x8xf32>
    %347 = math.exp %346 : vector<6x8xf32>
    %cst_125 = arith.constant 1.000000e+00 : f32
    %348 = vector.broadcast %cst_125 : f32 to vector<6x8xf32>
    %349 = arith.subf %347, %348 : vector<6x8xf32>
    %350 = arith.select %344, %342, %349 : vector<6x8xi1>, vector<6x8xf32>
    %351 = arith.addf %350, %310 : vector<6x8xf32>
    %cst_126 = arith.constant 0.000000e+00 : f32
    %352 = vector.broadcast %cst_126 : f32 to vector<6x8xf32>
    %353 = arith.cmpf ogt, %351, %352 : vector<6x8xf32>
    %cst_127 = arith.constant 0.000000e+00 : f32
    %354 = vector.broadcast %cst_127 : f32 to vector<6x8xf32>
    %355 = arith.minimumf %351, %354 : vector<6x8xf32>
    %356 = math.exp %355 : vector<6x8xf32>
    %cst_128 = arith.constant 1.000000e+00 : f32
    %357 = vector.broadcast %cst_128 : f32 to vector<6x8xf32>
    %358 = arith.subf %356, %357 : vector<6x8xf32>
    %359 = arith.select %353, %351, %358 : vector<6x8xi1>, vector<6x8xf32>
    %360 = vector.extract_strided_slice %359 {offsets = [5, 0], sizes = [1, 8], strides = [1, 1]} : vector<6x8xf32> to vector<1x8xf32>
    %c2_129 = arith.constant 2 : index
    %c0_130 = arith.constant 0 : index
    %c0_131 = arith.constant 0 : index
    %361 = vector.load %arg8[%c2_129, %c0_130, %c0_131] : memref<3x8x4xf32, #tpu.memory_space<vmem>>, vector<1x8x4xf32>
    %362 = vector.shape_cast %361 : vector<1x8x4xf32> to vector<8x4xf32>
    %cst_132 = arith.constant dense<0.000000e+00> : vector<1x4xf32>
    %363 = tpu.matmul %360, %362, %cst_132 {dimension_numbers = #tpu.dot_dimension_numbers<[1], [0], [0], [1], [0, 0, 1, 1], [], []>} : vector<1x8xf32>, vector<8x4xf32>, vector<1x4xf32> -> vector<1x4xf32>
    %364 = arith.addf %260, %363 : vector<1x4xf32>
    %365 = arith.addf %364, %268 : vector<1x4xf32>
    %cst_133 = arith.constant 0.333333343 : f32
    %366 = vector.broadcast %cst_133 : f32 to vector<1x4xf32>
    %367 = arith.mulf %365, %366 : vector<1x4xf32>
    %c0_134 = arith.constant 0 : index
    %c0_135 = arith.constant 0 : index
    %c0_136 = arith.constant 0 : index
    %368 = vector.load %arg10[%c0_134, %c0_135, %c0_136] : memref<1x1x4xf32, #tpu.memory_space<vmem>>, vector<1x1x4xf32>
    %369 = vector.shape_cast %368 : vector<1x1x4xf32> to vector<1x4xf32>
    %370 = vector.shape_cast %367 : vector<1x4xf32> to vector<1x1x4xf32>
    tpu.vector_store %arg10[%c0_134, %c0_135, %c0_136], %370 {strides = array<i32>} : memref<1x1x4xf32, #tpu.memory_space<vmem>>, vector<1x1x4xf32>,
    return
  }
  func.func @transform_0(%arg0: i32) -> (i32, i32, i32) {
    %c0_i32 = arith.constant 0 : i32
    %c0_i32_0 = arith.constant 0 : i32
    %c0_i32_1 = arith.constant 0 : i32
    return %arg0, %c0_i32, %c0_i32_0 : i32, i32, i32
  }
  func.func @transform_1(%arg0: i32) -> (i32, i32) {
    %c0_i32 = arith.constant 0 : i32
    %c0_i32_0 = arith.constant 0 : i32
    %c0_i32_1 = arith.constant 0 : i32
    return %c0_i32, %c0_i32_0 : i32, i32
  }
  func.func @transform_2(%arg0: i32) -> (i32, i32) {
    %c0_i32 = arith.constant 0 : i32
    %c0_i32_0 = arith.constant 0 : i32
    %c0_i32_1 = arith.constant 0 : i32
    return %c0_i32, %c0_i32_0 : i32, i32
  }
  func.func @transform_3(%arg0: i32) -> (i32, i32) {
    %c0_i32 = arith.constant 0 : i32
    %c0_i32_0 = arith.constant 0 : i32
    %c0_i32_1 = arith.constant 0 : i32
    return %c0_i32, %c0_i32_0 : i32, i32
  }
  func.func @transform_4(%arg0: i32) -> (i32, i32, i32) {
    %c0_i32 = arith.constant 0 : i32
    %c0_i32_0 = arith.constant 0 : i32
    %c0_i32_1 = arith.constant 0 : i32
    %c0_i32_2 = arith.constant 0 : i32
    return %c0_i32, %c0_i32_0, %c0_i32_1 : i32, i32, i32
  }
  func.func @transform_5(%arg0: i32) -> (i32, i32, i32) {
    %c0_i32 = arith.constant 0 : i32
    %c0_i32_0 = arith.constant 0 : i32
    %c0_i32_1 = arith.constant 0 : i32
    %c0_i32_2 = arith.constant 0 : i32
    return %c0_i32, %c0_i32_0, %c0_i32_1 : i32, i32, i32
  }
  func.func @transform_6(%arg0: i32) -> (i32, i32, i32) {
    %c0_i32 = arith.constant 0 : i32
    %c0_i32_0 = arith.constant 0 : i32
    %c0_i32_1 = arith.constant 0 : i32
    %c0_i32_2 = arith.constant 0 : i32
    return %c0_i32, %c0_i32_0, %c0_i32_1 : i32, i32, i32
  }
  func.func @transform_7(%arg0: i32) -> (i32, i32, i32) {
    %c0_i32 = arith.constant 0 : i32
    %c0_i32_0 = arith.constant 0 : i32
    %c0_i32_1 = arith.constant 0 : i32
    %c0_i32_2 = arith.constant 0 : i32
    return %c0_i32, %c0_i32_0, %c0_i32_1 : i32, i32, i32
  }
  func.func @transform_8(%arg0: i32) -> (i32, i32, i32) {
    %c0_i32 = arith.constant 0 : i32
    %c0_i32_0 = arith.constant 0 : i32
    %c0_i32_1 = arith.constant 0 : i32
    %c0_i32_2 = arith.constant 0 : i32
    return %c0_i32, %c0_i32_0, %c0_i32_1 : i32, i32, i32
  }
  func.func @transform_9(%arg0: i32) -> (i32, i32, i32) {
    %c0_i32 = arith.constant 0 : i32
    %c0_i32_0 = arith.constant 0 : i32
    %c0_i32_1 = arith.constant 0 : i32
    return %arg0, %c0_i32, %c0_i32_0 : i32, i32, i32
  }
}

</mosaic_0001>

<bundles_post_ra>
// kernel: atcnet_forward.1
= control target key start
LH: loop header
LB: loop body
LE: loop exit
PB: predicated region body
PF: predicated region fallthrough
CT: control target
= control target key end

     0   :  { %14 = vsyncpa [#allocation3], 0  ;;  %s4976_s0 = inlined_call_operand.vmem [shape: f32[2,128,512], index: 0, kind: input, shape index: {}]   ;;  %s4977_s1 = inlined_call_operand.vmem [shape: f32[16,129], index: 1, kind: input, shape index: {}]   ;;  %s4978_s2 = inlined_call_operand.vmem [shape: f32[512,79], index: 2, kind: input, shape index: {}]   ;;  %s4979_s3 = inlined_call_operand.vmem [shape: f32[8,64], index: 3, kind: input, shape index: {}]   ;;  %s4980_s4 = inlined_call_operand.vmem [shape: f32[3,8,24], index: 4, kind: input, shape index: {}]   ;;  %s4981_s5 = inlined_call_operand.vmem [shape: f32[3,8,8], index: 5, kind: input, shape index: {}]   ;;  %s4982_s6 = inlined_call_operand.vmem [shape: f32[3,64,8], index: 6, kind: input, shape index: {}]   ;;  %s4983_s7 = inlined_call_operand.vmem [shape: f32[3,8,4], index: 7, kind: input, shape index: {}]   ;;  %s4984_s8 = inlined_call_operand.vmem [shape: f32[3,8,24], index: 8, kind: input, shape index: {}]   ;;  %s4985_s9 = inlined_call_operand.hbm [shape: f32[2,1,4], index: 9, kind: output, shape index: {}]  }
   0x1   :  { %16 = vsyncpa [#allocation3 + $0x1], 0  ;;  %s4175_s30 = smov 0   ;;  %s4177_s10 = smov 0  }
   0x2   :  { %s4179_s11 = smov 0   ;;  %s4181_s12 = smov 0  }
   0x3 LB: > { %s4196_s13 = sadd.s32 4294967295, %s4098_s12   ;;  %s3461_s14 = sadd.s32 4294967294, %s4098_s12   ;;  %s4098_s12 = sphi %s4181_s12, %s5006_s12   ;;  %s4094_s11 = sphi %s4179_s11, %s5005_s11   ;;  %s4090_s10 = sphi %s4177_s10, %s5004_s10   ;;  %s4086_s30 = sphi %s4175_s30, %s5003_s30  }
   0x4   : > { %s4200_s15 = sadd.s32 1, %s4098_s12   ;;  %s223_s16 = sadd.s32 1, %s4094_s11 }
   0x5   : > { %s220_s17 = ssub.s32 %s4098_s12, %s4200_s15  ;;  %p233_p0 = scmp.ne.s32.totalorder %s4094_s11, %s4090_s10 }
   0x6   : > { %p221_p1 = scmp.eq.s32.totalorder %s220_s17, 0  ;;  %p234_p2 = scmp.eq.s32.totalorder %s4196_s13, 1 }
   0x7   : > { %p239_p3 = scmp.ne.s32.totalorder %s4090_s10, %s4086_s30  ;;  %p240_p4 = scmp.eq.s32.totalorder %s3461_s14, 1 }
   0x8   : > { %s4211_s18 = scalar_select %p221_p1, %s4094_s11, %s223_s16  }
   0x9   : > { %p4213_p5 = por %p234_p2, %p233_p0  ;;  %p4217_p6 = por %p240_p4, %p239_p3 }
   0xa   : > { %p3464_p7 = scmp.ge.s32.totalorder %s4098_s12, 1  ;;  %p290_p8 = scmp.lt.s32.totalorder %s4098_s12, 3 }
   0xc   : > { %p291_p9 = pnand %p3464_p7, %p290_p8 }
   0xd   : > { %p325_p10 = scmp.lt.s32.totalorder (!%p291_p9), %s4196_s13, 1  ;;  %s4102_s26 = smov (!%p291_p9), 114  }
   0xe   : > { %294 = sbr.rel (%p291_p9) target bundleno = 7375 (0x1ccf), region = 56  ;;  %s4104_s28 = smov (!%p291_p9), 115  }
   0xf   : > { %s4994_s29 = smov (!%p291_p9), 116   ;;  %s4106_s14 = smov (!%p291_p9), 117  }
  0x10   : > { %s4107_s16 = smov (!%p291_p9), 118   ;;  %s4108_s17 = smov (!%p291_p9), 119  }
  0x11   : > { %s4993_s21 = smov (!%p291_p9), 120   ;;  %s4110_s22 = smov (!%p291_p9), 121  }
  0x12   : > { %s4992_s25 = smov (!%p291_p9), 124  }
  0x13   : > { %v331_v0 = vld [vmem:[%s4977_s1 + $0x8] sm:$0xff]  ;;  %v4100_v1 = vmov 0.0   ;;  %s326_s23 = scalar_select %p325_p10, %s4196_s13, 1  ;;  %v4101_v2 = vmov 0   ;;  %vm4112_vm4 = vmmov 0   ;;  %vm901_vm5 = vcmask 523264  }
  0x14   : > { %467 = vmatprep.mubr.f32.mxu0 %v4100_v1  ;;  %538 = vmatprep.mubr.f32.mxu1 %v4100_v1  ;;  %vm984_vm7 = vcmask 64512   ;;  %vm1061_vm8 = vcmask 31744   ;;  %vm1136_vm9 = vcmask 46080   ;;  %vm1154_vm10 = vcmask 1045504  }
  0x15   : > { %3985 = vset.pattern.permute.xlu0 %v4101_v2  ;;  %s3549_s24 = sshll.u32 %s326_s23, 9  ;;  %s4111_s23 = smov 122   ;;  %vm1150_vm11 = vcmask 48128   ;;  %vm1487_vm12 = vcmask 1042432   ;;  %vm1498_vm13 = vcmask 1044480   ;;  %vm1506_vm14 = vcmask 130048  }
  0x16   : > { %400 = vperm.xlu0 %3985, %v331_v0   ;;  %s4233_s27 = scalar_lea.vmem %s4976_s0, %s3549_s24  ;;  %s4113_s24 = smov 123   ;;  %vm1508_vm15 = vcmask 195584  }
  0x17   : > { %v395_v3 = vld [vmem:[%s4233_s27 + $0x1e8] sm:$0xff]  ;;  %v397_v4 = vld [vmem:[%s4233_s27 + $0x1f8] sm:$0xff]  ;;  %v394_v5 = vld [vmem:[%s4233_s27 + $0x1e0] sm:$0xff] }
  0x18   : > { %403 = vmatprep.subr.mxu0 %v395_v3  ;;  %474 = vmatprep.subr.mxu1 %v397_v4  ;;  %v396_v6 = vld [vmem:[%s4233_s27 + $0x1f0] sm:$0xff]  ;;  %v391_v7 = vld [vmem:[%s4233_s27 + $0x1c8] sm:$0xff]  ;;  %v393_v8 = vld [vmem:[%s4233_s27 + $0x1d8] sm:$0xff] }
  0x19   : > { %404 = vmatpush1.msra.mxu0 %v394_v5  ;;  %475 = vmatpush1.msra.mxu1 %v396_v6  ;;  %v390_v9 = vld [vmem:[%s4233_s27 + $0x1c0] sm:$0xff]  ;;  %v392_v10 = vld [vmem:[%s4233_s27 + $0x1d0] sm:$0xff]  ;;  %v387_v11 = vld [vmem:[%s4233_s27 + $0x1a8] sm:$0xff] }
  0x1a   : > { %405 = vmatprep.subr.mxu0 %v391_v7  ;;  %476 = vmatprep.subr.mxu1 %v393_v8  ;;  %v389_v12 = vld [vmem:[%s4233_s27 + $0x1b8] sm:$0xff]  ;;  %v386_v13 = vld [vmem:[%s4233_s27 + $0x1a0] sm:$0xff]  ;;  %v388_v14 = vld [vmem:[%s4233_s27 + $0x1b0] sm:$0xff] }
  0x1b   : > { %406 = vmatpush1.msra.mxu0 %v390_v9  ;;  %477 = vmatpush1.msra.mxu1 %v392_v10  ;;  %v383_v15 = vld [vmem:[%s4233_s27 + $0x188] sm:$0xff]  ;;  %v385_v16 = vld [vmem:[%s4233_s27 + $0x198] sm:$0xff]  ;;  %v382_v17 = vld [vmem:[%s4233_s27 + $0x180] sm:$0xff] }
  0x1c   : > { %407 = vmatprep.subr.mxu0 %v387_v11  ;;  %478 = vmatprep.subr.mxu1 %v389_v12  ;;  %v384_v18 = vld [vmem:[%s4233_s27 + $0x190] sm:$0xff]  ;;  %v379_v19 = vld [vmem:[%s4233_s27 + $0x168] sm:$0xff]  ;;  %v381_v20 = vld [vmem:[%s4233_s27 + $0x178] sm:$0xff] }
  0x1d   : > { %408 = vmatpush1.msra.mxu0 %v386_v13  ;;  %479 = vmatpush1.msra.mxu1 %v388_v14  ;;  %v378_v21 = vld [vmem:[%s4233_s27 + $0x160] sm:$0xff]  ;;  %v380_v22 = vld [vmem:[%s4233_s27 + $0x170] sm:$0xff]  ;;  %v375_v23 = vld [vmem:[%s4233_s27 + $0x148] sm:$0xff] }
  0x1e   : > { %409 = vmatprep.subr.mxu0 %v383_v15  ;;  %480 = vmatprep.subr.mxu1 %v385_v16  ;;  %v377_v24 = vld [vmem:[%s4233_s27 + $0x158] sm:$0xff]  ;;  %v374_v25 = vld [vmem:[%s4233_s27 + $0x140] sm:$0xff]  ;;  %v376_v26 = vld [vmem:[%s4233_s27 + $0x150] sm:$0xff] }
  0x1f   : > { %410 = vmatpush1.msra.mxu0 %v382_v17  ;;  %481 = vmatpush1.msra.mxu1 %v384_v18  ;;  %v371_v27 = vld [vmem:[%s4233_s27 + $0x128] sm:$0xff]  ;;  %v373_v28 = vld [vmem:[%s4233_s27 + $0x138] sm:$0xff]  ;;  %v370_v29 = vld [vmem:[%s4233_s27 + $0x120] sm:$0xff] }
  0x20   : > { %411 = vmatprep.subr.mxu0 %v379_v19  ;;  %482 = vmatprep.subr.mxu1 %v381_v20  ;;  %v372_v30 = vld [vmem:[%s4233_s27 + $0x130] sm:$0xff]  ;;  %v367_v31 = vld [vmem:[%s4233_s27 + $0x108] sm:$0xff]  ;;  %v369_v32 = vld [vmem:[%s4233_s27 + $0x118] sm:$0xff] }
  0x21   : > { %412 = vmatpush1.msra.mxu0 %v378_v21  ;;  %483 = vmatpush1.msra.mxu1 %v380_v22  ;;  %v366_v33 = vld [vmem:[%s4233_s27 + $0x100] sm:$0xff]  ;;  %v368_v34 = vld [vmem:[%s4233_s27 + $0x110] sm:$0xff]  ;;  %v363_v35 = vld [vmem:[%s4233_s27 + $0xe8] sm:$0xff] }
  0x22   : > { %413 = vmatprep.subr.mxu0 %v375_v23  ;;  %484 = vmatprep.subr.mxu1 %v377_v24  ;;  %v365_v36 = vld [vmem:[%s4233_s27 + $0xf8] sm:$0xff]  ;;  %v362_v37 = vld [vmem:[%s4233_s27 + $0xe0] sm:$0xff]  ;;  %v364_v38 = vld [vmem:[%s4233_s27 + $0xf0] sm:$0xff] }
  0x23   : > { %414 = vmatpush1.msra.mxu0 %v374_v25  ;;  %485 = vmatpush1.msra.mxu1 %v376_v26  ;;  %v359_v39 = vld [vmem:[%s4233_s27 + $0xc8] sm:$0xff]  ;;  %v361_v40 = vld [vmem:[%s4233_s27 + $0xd8] sm:$0xff]  ;;  %v358_v41 = vld [vmem:[%s4233_s27 + $0xc0] sm:$0xff] }
  0x24   : > { %415 = vmatprep.subr.mxu0 %v371_v27  ;;  %486 = vmatprep.subr.mxu1 %v373_v28  ;;  %v360_v42 = vld [vmem:[%s4233_s27 + $0xd0] sm:$0xff]  ;;  %v355_v43 = vld [vmem:[%s4233_s27 + $0xa8] sm:$0xff]  ;;  %v357_v44 = vld [vmem:[%s4233_s27 + $0xb8] sm:$0xff] }
  0x25   : > { %416 = vmatpush1.msra.mxu0 %v370_v29  ;;  %487 = vmatpush1.msra.mxu1 %v372_v30  ;;  %v354_v45 = vld [vmem:[%s4233_s27 + $0xa0] sm:$0xff]  ;;  %v356_v46 = vld [vmem:[%s4233_s27 + $0xb0] sm:$0xff]  ;;  %v351_v47 = vld [vmem:[%s4233_s27 + $0x88] sm:$0xff] }
  0x26   : > { %417 = vmatprep.subr.mxu0 %v367_v31  ;;  %488 = vmatprep.subr.mxu1 %v369_v32  ;;  %v353_v48 = vld [vmem:[%s4233_s27 + $0x98] sm:$0xff]  ;;  %v350_v49 = vld [vmem:[%s4233_s27 + $0x80] sm:$0xff]  ;;  %v352_v50 = vld [vmem:[%s4233_s27 + $0x90] sm:$0xff] }
  0x27   : > { %418 = vmatpush1.msra.mxu0 %v366_v33  ;;  %489 = vmatpush1.msra.mxu1 %v368_v34  ;;  %v347_v51 = vld [vmem:[%s4233_s27 + $0x68] sm:$0xff]  ;;  %v349_v52 = vld [vmem:[%s4233_s27 + $0x78] sm:$0xff]  ;;  %v346_v53 = vld [vmem:[%s4233_s27 + $0x60] sm:$0xff] }
  0x28   : > { %419 = vmatprep.subr.mxu0 %v363_v35  ;;  %490 = vmatprep.subr.mxu1 %v365_v36  ;;  %v348_v54 = vld [vmem:[%s4233_s27 + $0x70] sm:$0xff]  ;;  %v343_v55 = vld [vmem:[%s4233_s27 + $0x48] sm:$0xff]  ;;  %v345_v56 = vld [vmem:[%s4233_s27 + $0x58] sm:$0xff] }
  0x29   : > { %420 = vmatpush1.msra.mxu0 %v362_v37  ;;  %491 = vmatpush1.msra.mxu1 %v364_v38  ;;  %v342_v57 = vld [vmem:[%s4233_s27 + $0x40] sm:$0xff]  ;;  %v344_v58 = vld [vmem:[%s4233_s27 + $0x50] sm:$0xff]  ;;  %v339_v59 = vld [vmem:[%s4233_s27 + $0x28] sm:$0xff] }
  0x2a   : > { %421 = vmatprep.subr.mxu0 %v359_v39  ;;  %492 = vmatprep.subr.mxu1 %v361_v40  ;;  %v341_v60 = vld [vmem:[%s4233_s27 + $0x38] sm:$0xff]  ;;  %v338_v61 = vld [vmem:[%s4233_s27 + $0x20] sm:$0xff]  ;;  %v340_v62 = vld [vmem:[%s4233_s27 + $0x30] sm:$0xff] }
  0x2b   : > { %422 = vmatpush1.msra.mxu0 %v358_v41  ;;  %493 = vmatpush1.msra.mxu1 %v360_v42  ;;  %v335_v63 = vld [vmem:[%s4233_s27 + $0x8] sm:$0xff]  ;;  %v337_v0 = vld [vmem:[%s4233_s27 + $0x18] sm:$0xff]  ;;  %v334_v2 = vld [vmem:[%s4233_s27] sm:$0xff] }
  0x2c   : > { %423 = vmatprep.subr.mxu0 %v355_v43  ;;  %494 = vmatprep.subr.mxu1 %v357_v44  ;;  %v336_v3 = vld [vmem:[%s4233_s27 + $0x10] sm:$0xff]  ;;  %v330_v4 = vld [vmem:[%s4977_s1] sm:$0xff]  ;;  %v600_v5 = vld [vmem:[%s4978_s2 + $0xf8] sm:$0xff]  ;;  %s4103_s27 = smov 113  }
  0x2d   : > { %424 = vmatpush1.msra.mxu0 %v354_v45  ;;  %495 = vmatpush1.msra.mxu1 %v356_v46  ;;  %v632_v6 = vld [vmem:[%s4978_s2 + $0x1f8] sm:$0xff]  ;;  %v599_v9 = vld [vmem:[%s4978_s2 + $0xf0] sm:$0xff]  ;;  %v598_v13 = vld [vmem:[%s4978_s2 + $0xe8] sm:$0xff] }
  0x2e   : > { %425 = vmatprep.subr.mxu0 %v351_v47  ;;  %496 = vmatprep.subr.mxu1 %v353_v48  ;;  %v584_v7 = vld [vmem:[%s4978_s2 + $0x78] sm:$0xff]  ;;  %v631_v10 = vld [vmem:[%s4978_s2 + $0x1f0] sm:$0xff]  ;;  %v630_v14 = vld [vmem:[%s4978_s2 + $0x1e8] sm:$0xff] }
  0x2f   : > { %426 = vmatpush1.msra.mxu0 %v350_v49  ;;  %497 = vmatpush1.msra.mxu1 %v352_v50  ;;  %v616_v8 = vld [vmem:[%s4978_s2 + $0x178] sm:$0xff]  ;;  %v583_v11 = vld [vmem:[%s4978_s2 + $0x70] sm:$0xff]  ;;  %v582_v15 = vld [vmem:[%s4978_s2 + $0x68] sm:$0xff] }
  0x30   : > { %427 = vmatprep.subr.mxu0 %v347_v51  ;;  %498 = vmatprep.subr.mxu1 %v349_v52  ;;  %v615_v12 = vld [vmem:[%s4978_s2 + $0x170] sm:$0xff]  ;;  %v614_v16 = vld [vmem:[%s4978_s2 + $0x168] sm:$0xff]  ;;  %v597_v17 = vld [vmem:[%s4978_s2 + $0xe0] sm:$0xff] }
  0x31   : > { %428 = vmatpush1.msra.mxu0 %v346_v53  ;;  %499 = vmatpush1.msra.mxu1 %v348_v54  ;;  %v629_v18 = vld [vmem:[%s4978_s2 + $0x1e0] sm:$0xff]  ;;  %v596_v21 = vld [vmem:[%s4978_s2 + $0xd8] sm:$0xff]  ;;  %v595_v25 = vld [vmem:[%s4978_s2 + $0xd0] sm:$0xff] }
  0x32   : > { %429 = vmatprep.subr.mxu0 %v343_v55  ;;  %500 = vmatprep.subr.mxu1 %v345_v56  ;;  %v581_v19 = vld [vmem:[%s4978_s2 + $0x60] sm:$0xff]  ;;  %v628_v22 = vld [vmem:[%s4978_s2 + $0x1d8] sm:$0xff]  ;;  %v627_v26 = vld [vmem:[%s4978_s2 + $0x1d0] sm:$0xff] }
  0x33   : > { %430 = vmatpush1.msra.mxu0 %v342_v57  ;;  %501 = vmatpush1.msra.mxu1 %v344_v58  ;;  %v613_v20 = vld [vmem:[%s4978_s2 + $0x160] sm:$0xff]  ;;  %v580_v23 = vld [vmem:[%s4978_s2 + $0x58] sm:$0xff]  ;;  %v579_v27 = vld [vmem:[%s4978_s2 + $0x50] sm:$0xff] }
  0x34   : > { %431 = vmatprep.subr.mxu0 %v339_v59  ;;  %502 = vmatprep.subr.mxu1 %v341_v60  ;;  %v612_v24 = vld [vmem:[%s4978_s2 + $0x158] sm:$0xff]  ;;  %v611_v28 = vld [vmem:[%s4978_s2 + $0x150] sm:$0xff]  ;;  %v594_v29 = vld [vmem:[%s4978_s2 + $0xc8] sm:$0xff] }
  0x35   : > { %432 = vmatpush1.msra.mxu0 %v338_v61  ;;  %503 = vmatpush1.msra.mxu1 %v340_v62  ;;  %v626_v30 = vld [vmem:[%s4978_s2 + $0x1c8] sm:$0xff]  ;;  %v593_v33 = vld [vmem:[%s4978_s2 + $0xc0] sm:$0xff]  ;;  %v592_v37 = vld [vmem:[%s4978_s2 + $0xb8] sm:$0xff] }
  0x36   : > { %433 = vmatprep.subr.mxu0 %v335_v63  ;;  %504 = vmatprep.subr.mxu1 %v337_v0  ;;  %v578_v31 = vld [vmem:[%s4978_s2 + $0x48] sm:$0xff]  ;;  %v625_v34 = vld [vmem:[%s4978_s2 + $0x1c0] sm:$0xff]  ;;  %v624_v38 = vld [vmem:[%s4978_s2 + $0x1b8] sm:$0xff] }
  0x37   : > { %434 = vmatpush1.msra.mxu0 %v334_v2  ;;  %505 = vmatpush1.msra.mxu1 %v336_v3  ;;  %v610_v32 = vld [vmem:[%s4978_s2 + $0x148] sm:$0xff]  ;;  %v577_v35 = vld [vmem:[%s4978_s2 + $0x40] sm:$0xff]  ;;  %v576_v39 = vld [vmem:[%s4978_s2 + $0x38] sm:$0xff] }
  0x38   : > { %468 = vmatmul.mubr.f32.vlgmr.msra.gmra.mxu0 %v330_v4  ;;  %539 = vmatmul.mubr.f32.vlgmr.msra.gmra.mxu1 %v330_v4  ;;  %v609_v36 = vld [vmem:[%s4978_s2 + $0x140] sm:$0xff]  ;;  %v608_v40 = vld [vmem:[%s4978_s2 + $0x138] sm:$0xff]  ;;  %v591_v41 = vld [vmem:[%s4978_s2 + $0xb0] sm:$0xff] }
  0x39   : > { %3550 = vmatprep.subr.mxu0 %v600_v5  ;;  %3585 = vmatprep.subr.mxu1 %v632_v6  ;;  %v623_v42 = vld [vmem:[%s4978_s2 + $0x1b0] sm:$0xff]  ;;  %v590_v45 = vld [vmem:[%s4978_s2 + $0xa8] sm:$0xff]  ;;  %v589_v49 = vld [vmem:[%s4978_s2 + $0xa0] sm:$0xff] }
  0x3a   : > { %3551 = vmatpush3.msra.mxu0 %v584_v7  ;;  %3586 = vmatpush3.msra.mxu1 %v616_v8  ;;  %v575_v43 = vld [vmem:[%s4978_s2 + $0x30] sm:$0xff]  ;;  %v622_v46 = vld [vmem:[%s4978_s2 + $0x1a8] sm:$0xff]  ;;  %v621_v50 = vld [vmem:[%s4978_s2 + $0x1a0] sm:$0xff] }
  0x3b   : > { %3552 = vmatprep.subr.mxu0 %v599_v9  ;;  %3587 = vmatprep.subr.mxu1 %v631_v10  ;;  %v607_v44 = vld [vmem:[%s4978_s2 + $0x130] sm:$0xff]  ;;  %v574_v47 = vld [vmem:[%s4978_s2 + $0x28] sm:$0xff]  ;;  %v573_v51 = vld [vmem:[%s4978_s2 + $0x20] sm:$0xff] }
  0x3c   : > { %3553 = vmatpush3.msra.mxu0 %v583_v11  ;;  %3588 = vmatpush3.msra.mxu1 %v615_v12  ;;  %v606_v48 = vld [vmem:[%s4978_s2 + $0x128] sm:$0xff]  ;;  %v605_v52 = vld [vmem:[%s4978_s2 + $0x120] sm:$0xff]  ;;  %v588_v53 = vld [vmem:[%s4978_s2 + $0x98] sm:$0xff] }
  0x3d   : > { %3554 = vmatprep.subr.mxu0 %v598_v13  ;;  %3589 = vmatprep.subr.mxu1 %v630_v14  ;;  %v620_v54 = vld [vmem:[%s4978_s2 + $0x198] sm:$0xff]  ;;  %v587_v57 = vld [vmem:[%s4978_s2 + $0x90] sm:$0xff]  ;;  %v586_v61 = vld [vmem:[%s4978_s2 + $0x88] sm:$0xff] }
  0x3e   : > { %3555 = vmatpush3.msra.mxu0 %v582_v15  ;;  %3590 = vmatpush3.msra.mxu1 %v614_v16  ;;  %v572_v55 = vld [vmem:[%s4978_s2 + $0x18] sm:$0xff]  ;;  %v619_v58 = vld [vmem:[%s4978_s2 + $0x190] sm:$0xff]  ;;  %v618_v62 = vld [vmem:[%s4978_s2 + $0x188] sm:$0xff] }
  0x3f   : > { %3556 = vmatprep.subr.mxu0 %v597_v17  ;;  %3591 = vmatprep.subr.mxu1 %v629_v18  ;;  %v604_v56 = vld [vmem:[%s4978_s2 + $0x118] sm:$0xff]  ;;  %v571_v59 = vld [vmem:[%s4978_s2 + $0x10] sm:$0xff]  ;;  %v570_v63 = vld [vmem:[%s4978_s2 + $0x8] sm:$0xff] }
  0x40   : > { %3557 = vmatpush3.msra.mxu0 %v581_v19  ;;  %3592 = vmatpush3.msra.mxu1 %v613_v20  ;;  %v603_v60 = vld [vmem:[%s4978_s2 + $0x110] sm:$0xff]  ;;  %v602_v0 = vld [vmem:[%s4978_s2 + $0x108] sm:$0xff]  ;;  %v585_v2 = vld [vmem:[%s4978_s2 + $0x80] sm:$0xff] }
  0x41   : > { %3558 = vmatprep.subr.mxu0 %v596_v21  ;;  %3593 = vmatprep.subr.mxu1 %v628_v22  ;;  %v617_v3 = vld [vmem:[%s4978_s2 + $0x180] sm:$0xff] }
  0x42   : > { %3559 = vmatpush3.msra.mxu0 %v580_v23  ;;  %3594 = vmatpush3.msra.mxu1 %v612_v24  ;;  %v569_v4 = vld [vmem:[%s4978_s2] sm:$0xff] }
  0x43   : > { %3560 = vmatprep.subr.mxu0 %v595_v25  ;;  %3595 = vmatprep.subr.mxu1 %v627_v26  ;;  %v601_v5 = vld [vmem:[%s4978_s2 + $0x100] sm:$0xff] }
  0x44   : > { %3561 = vmatpush3.msra.mxu0 %v579_v27  ;;  %3596 = vmatpush3.msra.mxu1 %v611_v28 }
  0x45   : > { %3562 = vmatprep.subr.mxu0 %v594_v29  ;;  %3597 = vmatprep.subr.mxu1 %v626_v30 }
  0x46   : > { %3563 = vmatpush3.msra.mxu0 %v578_v31  ;;  %3598 = vmatpush3.msra.mxu1 %v610_v32 }
  0x47   : > { %3564 = vmatprep.subr.mxu0 %v593_v33  ;;  %3599 = vmatprep.subr.mxu1 %v625_v34 }
  0x48   : > { %3565 = vmatpush3.msra.mxu0 %v577_v35  ;;  %3600 = vmatpush3.msra.mxu1 %v609_v36 }
  0x49   : > { %3566 = vmatprep.subr.mxu0 %v592_v37  ;;  %3601 = vmatprep.subr.mxu1 %v624_v38 }
  0x4a   : > { %3567 = vmatpush3.msra.mxu0 %v576_v39  ;;  %3602 = vmatpush3.msra.mxu1 %v608_v40 }
  0x4b   : > { %3568 = vmatprep.subr.mxu0 %v591_v41  ;;  %3603 = vmatprep.subr.mxu1 %v623_v42  ;;  %v333_v42 = vld [vmem:[%s4977_s1 + $0x18] sm:$0xff] }
  0x4c   : > { %3569 = vmatpush3.msra.mxu0 %v575_v43  ;;  %3604 = vmatpush3.msra.mxu1 %v607_v44 }
  0x4d   : > { %3570 = vmatprep.subr.mxu0 %v590_v45  ;;  %3605 = vmatprep.subr.mxu1 %v622_v46 }
  0x4e   : > { %3571 = vmatpush3.msra.mxu0 %v574_v47  ;;  %3606 = vmatpush3.msra.mxu1 %v606_v48 }
  0x4f   : > { %3572 = vmatprep.subr.mxu0 %v589_v49  ;;  %3607 = vmatprep.subr.mxu1 %v621_v50 }
  0x50   : > { %3573 = vmatpush3.msra.mxu0 %v573_v51  ;;  %3608 = vmatpush3.msra.mxu1 %v605_v52 }
  0x51   : > { %3574 = vmatprep.subr.mxu0 %v588_v53  ;;  %3609 = vmatprep.subr.mxu1 %v620_v54 }
  0x52   : > { %3575 = vmatpush3.msra.mxu0 %v572_v55  ;;  %3610 = vmatpush3.msra.mxu1 %v604_v56 }
  0x53   : > { %3576 = vmatprep.subr.mxu0 %v587_v57  ;;  %3611 = vmatprep.subr.mxu1 %v619_v58  ;;  %v332_v58 = vld [vmem:[%s4977_s1 + $0x10] sm:$0xff] }
  0x54   : > { %3577 = vmatpush3.msra.mxu0 %v571_v59  ;;  %3612 = vmatpush3.msra.mxu1 %v603_v60 }
  0x55   : > { %3578 = vmatprep.subr.mxu0 %v586_v61  ;;  %3613 = vmatprep.subr.mxu1 %v618_v62 }
  0x56   : > { %3579 = vmatpush3.msra.mxu0 %v570_v63  ;;  %3614 = vmatpush3.msra.mxu1 %v602_v0 }
  0x57   : > { %3580 = vmatprep.subr.mxu0 %v585_v2  ;;  %3615 = vmatprep.subr.mxu1 %v617_v3 }
  0x58   : > { %3581 = vmatpush3.msra.mxu0 %v569_v4  ;;  %3616 = vmatpush3.msra.mxu1 %v601_v5  ;;  %v900_v5 = vld [vmem:[%s4979_s3] sm:$0xff] }
  0x59   : > { %3711 = vmatprep.subr.mxu0 %v4100_v1  ;;  %3746 = vmatprep.subr.mxu1 %v4100_v1 }
  0x91   : > { %v401_v6 = vpop.permute.xlu0 %400 }
  0xf8   : > { %v469_v7 = vpop.f32.mrf.mxu0  ;;  %v540_v8 = vpop.f32.mrf.mxu1 }
  0xf9   : > { %v470_v9 = vadd.f32 %v469_v7, %v401_v6  ;;  %v541_v10 = vadd.f32 %v540_v8, %v401_v6 }
  0xfa   : > { %v471_v11 = vpop.f32.mrf.mxu0  ;;  %v542_v12 = vpop.f32.mrf.mxu1 }
  0xfb   : > { %v549_v13 = vmin.f32 %v470_v9, 0.0  ;;  %v551_v14 = vmin.f32 %v541_v10, 0.0  ;;  %v472_v15 = vadd.f32 %v471_v11, %v401_v6  ;;  %v543_v16 = vadd.f32 %v542_v12, %v401_v6  ;;  %v979_v6 = vld [vmem:[%s4980_s4] sm:$0xff] }
  0xfc   : > { %vm545_vm1 = vcmp.gt.f32.partialorder %v470_v9, 0.0  ;;  %vm547_vm3 = vcmp.gt.f32.partialorder %v541_v10, 0.0  ;;  %v4569_v12 = vld [vmem:[%s4984_s8] sm:$0xff] }
  0xfd   : > { %v553_v17 = vmul.f32 1.442695, %v549_v13  ;;  %v557_v18 = vmul.f32 1.442695, %v551_v14  ;;  %v550_v19 = vmin.f32 %v472_v15, 0.0  ;;  %v552_v20 = vmin.f32 %v543_v16, 0.0 }
  0xfe   : > { %vm546_vm0 = vcmp.gt.f32.partialorder %v472_v15, 0.0  ;;  %vm548_vm2 = vcmp.gt.f32.partialorder %v543_v16, 0.0 }
  0xff   : > { %3986 = vpow2.f32 %v553_v17  ;;  %v555_v21 = vmul.f32 1.442695, %v550_v19  ;;  %v559_v22 = vmul.f32 1.442695, %v552_v20 }
 0x100   : > { %3988 = vpow2.f32 %v557_v18 }
 0x101   : > { %3990 = vpow2.f32 %v555_v21 }
 0x102   : > { %3992 = vpow2.f32 %v559_v22 }
 0x10c   : > { %v3987_v23 = vpop.eup %3986 }
 0x10d   : > { %v3989_v24 = vpop.eup %3988  ;;  %v3467_v26 = vadd.f32 -1.0, %v3987_v23 }
 0x10e   : > { %v3991_v25 = vpop.eup %3990  ;;  %v3469_v29 = vadd.f32 -1.0, %v3989_v24 }
 0x10f   : > { %v3993_v27 = vpop.eup %3992  ;;  %v3468_v28 = vadd.f32 -1.0, %v3991_v25  ;;  %v565_v33 = vsel %vm545_vm1, %v470_v9, %v3467_v26  ;;  %v980_v9 = vlaneseq }
 0x110   : > { %v3470_v30 = vadd.f32 -1.0, %v3993_v27  ;;  %v567_v34 = vsel %vm547_vm3, %v541_v10, %v3469_v29 }
 0x111   : > { %v566_v31 = vsel %vm546_vm0, %v472_v15, %v3468_v28  ;;  %v4561_v10 = vshrl.u32 %v980_v9, 7  ;;  %vm1514_vm0 = vcmask 261120  }
 0x112   : > { %697 = vmatprep.mubr.f32.mxu0 %v566_v31  ;;  %v568_v32 = vsel %vm548_vm2, %v543_v16, %v3470_v30 }
 0x113   : > { %767 = vmatprep.mubr.f32.mxu1 %v568_v32  ;;  %698 = vmatmul.mubr.f32.vlgmr.msra.gmra.mxu0 %v565_v33  ;;  %v4564_v11 = vsub.s32 0, %v4561_v10 }
 0x114   : > { %768 = vmatmul.mubr.f32.vlgmr.msra.gmra.mxu1 %v567_v34  ;;  %3743 = vmatprep.mubr.msk.f32.mxu0 %vm4112_vm4, %v4100_v1 }
 0x115   : > { %3748 = vmatprep.mubr.msk.f32.mxu1 %vm4112_vm4, %v4100_v1  ;;  %v983_v13 = vrot.slane %v4569_v12, %v4564_v11 }
 0x1d3   : > { %v3582_v35 = vpop.f32.mrf.mxu0 }
 0x1d4   : > { %v3617_v36 = vpop.f32.mrf.mxu1 }
 0x1d5   : > { %v3583_v37 = vpop.f32.mrf.mxu0 }
 0x1d6   : > { %v3584_v38 = vadd.f32 %v3583_v37, %v3582_v35  ;;  %v3618_v39 = vpop.f32.mrf.mxu1 }
 0x1d7   : > { %v3619_v40 = vadd.f32 %v3618_v39, %v3617_v36 }
 0x1d9   : > { %v4496_v41 = vadd.f32 %v3619_v40, %v3584_v38 }
 0x1db   : > { %813 = vrot.lane.b32.xlu1 %v4496_v41, %s4102_s26  ;;  %816 = vrot.lane.b32.xlu0 %v4496_v41, %s4103_s27  ;;  %s4115_s26 = smov 125   ;;  %s4116_s27 = smov 126  }
 0x1df   : > { %810 = vrot.lane.b32.xlu1 %v4496_v41, %s4104_s28  ;;  %807 = vrot.lane.b32.xlu0 %v4496_v41, %s4994_s29  ;;  %s4121_s28 = smov 16  }
 0x1e3   : > { %804 = vrot.lane.b32.xlu1 %v4496_v41, %s4106_s14  ;;  %801 = vrot.lane.b32.xlu0 %v4496_v41, %s4107_s16  ;;  %s4117_s16 = smov 127   ;;  %s4122_s14 = smov 8  }
 0x1e7   : > { %798 = vrot.lane.b32.xlu1 %v4496_v41, %s4108_s17  ;;  %795 = vrot.lane.b32.xlu0 %v4496_v41, %s4993_s21  ;;  %s4988_s17 = smov 108  }
 0x1eb   : > { %792 = vrot.lane.b32.xlu1 %v4496_v41, %s4110_s22  ;;  %789 = vrot.lane.b32.xlu0 %v4496_v41, %s4111_s23  ;;  %s4123_s22 = smov 24   ;;  %s4999_s23 = smov 4  }
 0x1ef   : > { %786 = vrot.lane.b32.xlu1 %v4496_v41, %s4113_s24  ;;  %783 = vrot.lane.b32.xlu0 %v4496_v41, %s4992_s25  ;;  %s4986_s24 = smov 4  }
 0x1f3   : > { %780 = vrot.lane.b32.xlu1 %v4496_v41, %s4115_s26  ;;  %777 = vrot.lane.b32.xlu0 %v4496_v41, %s4116_s27  ;;  %s5001_s27 = smov 120   ;;  %s5002_s26 = smov 124  }
 0x1f7   : > { %774 = vrot.lane.b32.xlu1 %v4496_v41, %s4117_s16  ;;  %821 = vperm.xlu0 %3985, %v333_v42   ;;  %s4990_s16 = smov 112  }
 0x24d   : > { %v814_v43 = vpop.permute.xlu1 %813  ;;  %v817_v44 = vpop.permute.xlu0 %816 }
 0x24e   : > { %3712 = vmatpush3.msra.mxu0 %v817_v44 }
 0x24f   : > { %3713 = vmatprep.subr.mxu0 %v4100_v1 }
 0x250   : > { %3714 = vmatpush3.msra.mxu0 %v814_v43 }
 0x251   : > { %v811_v45 = vpop.permute.xlu1 %810  ;;  %3715 = vmatprep.subr.mxu0 %v4100_v1  ;;  %v808_v46 = vpop.permute.xlu0 %807 }
 0x252   : > { %3716 = vmatpush3.msra.mxu0 %v811_v45 }
 0x253   : > { %3717 = vmatprep.subr.mxu0 %v4100_v1 }
 0x254   : > { %3718 = vmatpush3.msra.mxu0 %v808_v46  ;;  %v1398_v46 = vld [vmem:[%s4981_s5] sm:$0xff] }
 0x255   : > { %v805_v47 = vpop.permute.xlu1 %804  ;;  %3719 = vmatprep.subr.mxu0 %v4100_v1  ;;  %v802_v48 = vpop.permute.xlu0 %801 }
 0x256   : > { %3720 = vmatpush3.msra.mxu0 %v805_v47 }
 0x257   : > { %3721 = vmatprep.subr.mxu0 %v4100_v1 }
 0x258   : > { %3722 = vmatpush3.msra.mxu0 %v802_v48 }
 0x259   : > { %v799_v49 = vpop.permute.xlu1 %798  ;;  %3723 = vmatprep.subr.mxu0 %v4100_v1  ;;  %v796_v50 = vpop.permute.xlu0 %795 }
 0x25a   : > { %3724 = vmatpush3.msra.mxu0 %v799_v49 }
 0x25b   : > { %3725 = vmatprep.subr.mxu0 %v4100_v1 }
 0x25c   : > { %3726 = vmatpush3.msra.mxu0 %v796_v50 }
 0x25d   : > { %v793_v51 = vpop.permute.xlu1 %792  ;;  %3727 = vmatprep.subr.mxu0 %v4100_v1  ;;  %v790_v52 = vpop.permute.xlu0 %789 }
 0x25e   : > { %3728 = vmatpush3.msra.mxu0 %v793_v51  ;;  %v1479_v51 = vld [vmem:[%s4982_s6 + $0x18] sm:$0xff] }
 0x25f   : > { %3729 = vmatprep.subr.mxu0 %v4100_v1 }
 0x260   : > { %3730 = vmatpush3.msra.mxu0 %v790_v52  ;;  %v4616_v52 = vsub.s32 1, %v4561_v10 }
 0x261   : > { %v787_v53 = vpop.permute.xlu1 %786  ;;  %3731 = vmatprep.subr.mxu0 %v4100_v1  ;;  %v784_v54 = vpop.permute.xlu0 %783 }
 0x262   : > { %3732 = vmatpush3.msra.mxu0 %v787_v53  ;;  %v1478_v53 = vld [vmem:[%s4982_s6 + $0x10] sm:$0xff] }
 0x263   : > { %3733 = vmatprep.subr.mxu0 %v4100_v1 }
 0x264   : > { %3734 = vmatpush3.msra.mxu0 %v784_v54  ;;  %v1477_v54 = vld [vmem:[%s4982_s6 + $0x8] sm:$0xff] }
 0x265   : > { %v781_v55 = vpop.permute.xlu1 %780  ;;  %3735 = vmatprep.subr.mxu0 %v4100_v1  ;;  %v778_v56 = vpop.permute.xlu0 %777 }
 0x266   : > { %3736 = vmatpush3.msra.mxu0 %v781_v55  ;;  %v1402_v55 = vrot.slane %v4569_v12, %v4616_v52 }
 0x267   : > { %3737 = vmatprep.subr.mxu0 %v4100_v1 }
 0x268   : > { %3738 = vmatpush3.msra.mxu0 %v778_v56  ;;  %v1476_v56 = vld [vmem:[%s4982_s6] sm:$0xff] }
 0x269   : > { %v775_v57 = vpop.permute.xlu1 %774  ;;  %3739 = vmatprep.subr.mxu0 %v4100_v1 }
 0x26a   : > { %3740 = vmatpush3.msra.mxu0 %v775_v57 }
 0x26b   : > { %3741 = vmatprep.subr.mxu0 %v4100_v1 }
 0x26c   : > { %3742 = vmatpush3.msra.mxu0 %v4496_v41 }
 0x26d   : > { %3744 = vmatmul.mubr.f32.vlgmr.msra.gmra.mxu0 %v332_v58  ;;  %3792 = vmatprep.subr.mxu0 %v4100_v1 }
 0x26e   : > { %3800 = vmatprep.mubr.msk.f32.mxu0 %vm4112_vm4, %v4100_v1 }
 0x272   : > { %v822_v59 = vpop.permute.xlu0 %821 }
 0x32d   : > { %v890_v60 = vpop.f32.mrf.mxu0 }
 0x32e   : > { %v891_v61 = vadd.f32 %v890_v60, %v822_v59 }
 0x32f   : > { %v3745_v62 = vpop.f32.mrf.mxu0 }
 0x330   : > { %v895_v63 = vmin.f32 %v891_v61, 0.0  ;;  %vm894_vm6 = vcmp.gt.f32.partialorder %v891_v61, 0.0 }
 0x332   : > { %v896_v0 = vmul.f32 1.442695, %v895_v63 }
 0x334   : > { %3994 = vpow2.f32 %v896_v0 }
 0x341   : > { %v3995_v2 = vpop.eup %3994 }
 0x342   : > { %v3471_v3 = vadd.f32 -1.0, %v3995_v2 }
 0x344   : > { %v899_v4 = vsel %vm894_vm6, %v891_v61, %v3471_v3 }
 0x345   : > { %3747 = vmatpush3.xpose.msk.msra.mxu1 %vm901_vm5, %v899_v4 }
 0x346   : > { %3751 = vmatprep.subr.mxu1 %v4100_v1 }
 0x348   : > { %3749 = vmatmul.mubr.msk.f32.vlgmr.msra.gmra.mxu1 %vm901_vm5, %v900_v5 }
 0x349   : > { %3752 = vmatpush3.msra.mxu1 %v979_v6  ;;  %3753 = vmatprep.mubr.msk.f32.mxu1 %vm4112_vm4, %v4100_v1 }
 0x34a   : > { %3756 = vmatprep.subr.mxu1 %v4100_v1 }
 0x408   : > { %v4555_v7 = vpop.f32.mrf.mxu1 }
 0x409   : > { %3754 = vmatmul.mubr.msk.f32.vlgmr.msra.gmra.mxu1 %vm984_vm7, %v4555_v7 }
 0x40a   : > { %v3750_v8 = vpop.f32.mrf.mxu1  ;;  %3758 = vmatprep.mubr.msk.f32.mxu1 %vm4112_vm4, %v4100_v1 }
 0x4c9   : > { %v1054_v14 = vpop.f32.mrf.mxu1 }
 0x4ca   : > { %v1055_v15 = vadd.f32 %v1054_v14, %v983_v13  ;;  %v1483_v14 = vld [vmem:[%s4982_s6 + $0x38] sm:$0xff] }
 0x4cb   : > { %v3755_v16 = vpop.f32.mrf.mxu1  ;;  %3793 = vmatpush3.msra.mxu0 %v1483_v14 }
 0x4cc   : > { %1059 = vrot.lane.b32.xlu1 %v1055_v15, %s4993_s21  ;;  %3794 = vmatprep.subr.mxu0 %v4100_v1 }
 0x53e   : > { %v1060_v17 = vpop.permute.xlu1 %1059 }
 0x53f   : > { %3757 = vmatpush3.xpose.msk.msra.mxu1 %vm1061_vm8, %v1060_v17 }
 0x540   : > { %3761 = vmatprep.subr.mxu1 %v4100_v1 }
 0x542   : > { %3759 = vmatmul.mubr.msk.f32.vlgmr.msra.gmra.mxu1 %vm1061_vm8, %v1055_v15 }
 0x543   : > { %3763 = vmatprep.mubr.msk.f32.mxu1 %vm4112_vm4, %v4100_v1 }
 0x602   : > { %v1132_v18 = vpop.f32.mrf.mxu1 }
 0x603   : > { %v1137_v19 = vsel %vm1136_vm9, %v1132_v18, -inf }
 0x604   : > { %1138 = vmax.xlane.f32.xlu0 %v1137_v19  ;;  %v3760_v20 = vpop.f32.mrf.mxu1 }
 0x61a   : > { %1148 = vrot.lane.b32.xlu0 %v1055_v15, %s4990_s16  ;;  %s4997_s16 = smov 112  }
 0x61e   : > { %1227 = vrot.lane.b32.xlu0 %v1055_v15, %s4992_s25 }
 0x68d   : > { %v1139_v21 = vpop.xlane.xlu0 %1138 }
 0x68e   : > { %v1140_v22 = vsub.f32 %v1132_v18, %v1139_v21 }
 0x690   : > { %v1141_v23 = vmul.f32 1.442695, %v1140_v22  ;;  %v1482_v22 = vld [vmem:[%s4982_s6 + $0x30] sm:$0xff] }
 0x691   : > { %v1149_v24 = vpop.permute.xlu0 %1148  ;;  %3795 = vmatpush3.msra.mxu0 %v1482_v22 }
 0x692   : > { %3996 = vpow2.f32 %v1141_v23  ;;  %3762 = vmatpush3.msk.msra.mxu1 %vm1154_vm10, %v1149_v24  ;;  %v1481_v23 = vld [vmem:[%s4982_s6 + $0x28] sm:$0xff]  ;;  %3796 = vmatprep.subr.mxu0 %v4100_v1 }
 0x693   : > { %3766 = vmatprep.subr.mxu1 %v4100_v1  ;;  %3797 = vmatpush3.msra.mxu0 %v1481_v23 }
 0x694   : > { %3798 = vmatprep.subr.mxu0 %v4100_v1 }
 0x695   : > { %v1228_v31 = vpop.permute.xlu0 %1227 }
 0x69f   : > { %v3997_v25 = vpop.eup %3996 }
 0x6a0   : > { %v1143_v26 = vsel %vm1136_vm9, %v3997_v25, 0.0 }
 0x6a1   : > { %1144 = vadd.xlane.f32.xlu1 %v1143_v26 }
 0x6b2   : > { %1229 = vrot.lane.b32.xlu1 %v1055_v15, %s4994_s29 }
 0x72a   : > { %v1145_v27 = vpop.xlane.xlu1 %1144 }
 0x72b   : > { %3998 = vrcp.f32 %v1145_v27 }
 0x72e   : > { %v1230_v30 = vpop.permute.xlu1 %1229 }
 0x738   : > { %v3999_v28 = vpop.eup %3998 }
 0x739   : > { %v1147_v29 = vmul.f32 %v3999_v28, %v3997_v25  ;;  %v1480_v25 = vld [vmem:[%s4982_s6 + $0x20] sm:$0xff] }
 0x73a   : > { %3799 = vmatpush3.msra.mxu0 %v1480_v25 }
 0x73b   : > { %3764 = vmatmul.mubr.msk.f32.vlgmr.msra.gmra.mxu1 %vm1150_vm11, %v1147_v29  ;;  %3808 = vmatprep.subr.mxu0 %v4100_v1 }
 0x73c   : > { %3767 = vmatpush3.xpose.msk.msra.mxu1 %vm1061_vm8, %v1230_v30  ;;  %3768 = vmatprep.mubr.msk.f32.mxu1 %vm4112_vm4, %v4100_v1 }
 0x73d   : > { %3771 = vmatprep.subr.mxu1 %v4100_v1 }
 0x73f   : > { %3769 = vmatmul.mubr.msk.f32.vlgmr.msra.gmra.mxu1 %vm1061_vm8, %v1228_v31 }
 0x740   : > { %3773 = vmatprep.mubr.msk.f32.mxu1 %vm4112_vm4, %v4100_v1 }
 0x7fb   : > { %v1223_v32 = vpop.f32.mrf.mxu1 }
 0x7fd   : > { %v3765_v33 = vpop.f32.mrf.mxu1 }
 0x7ff   : > { %v1301_v34 = vpop.f32.mrf.mxu1 }
 0x800   : > { %v1305_v35 = vsel %vm1136_vm9, %v1301_v34, -inf }
 0x801   : > { %1306 = vmax.xlane.f32.xlu1 %v1305_v35  ;;  %v3770_v36 = vpop.f32.mrf.mxu1 }
 0x88a   : > { %v1307_v37 = vpop.xlane.xlu1 %1306 }
 0x88b   : > { %v1308_v38 = vsub.f32 %v1301_v34, %v1307_v37 }
 0x88d   : > { %v1309_v39 = vmul.f32 1.442695, %v1308_v38 }
 0x88f   : > { %4000 = vpow2.f32 %v1309_v39 }
 0x89c   : > { %v4001_v40 = vpop.eup %4000 }
 0x89d   : > { %v1311_v41 = vsel %vm1136_vm9, %v4001_v40, 0.0 }
 0x89e   : > { %1312 = vadd.xlane.f32.xlu0 %v1311_v41 }
 0x8b4   : > { %1316 = vrot.lane.b32.xlu0 %v1055_v15, %s4988_s17  ;;  %v4651_v15 = vsub.s32 2, %v4561_v10  ;;  %s4998_s17 = smov 108  }
 0x8b6   : > { %v1513_v16 = vrot.slane %v4569_v12, %v4651_v15 }
 0x927   : > { %v1313_v42 = vpop.xlane.xlu0 %1312 }
 0x928   : > { %4002 = vrcp.f32 %v1313_v42  ;;  %v1792_v42 = vrot.slane %v4555_v7, 1 }
 0x92b   : > { %v1317_v43 = vpop.permute.xlu0 %1316 }
 0x92c   : > { %3772 = vmatpush3.msk.msra.mxu1 %vm1154_vm10, %v1317_v43  ;;  %v1706_v43 = vld [vmem:[%s4983_s7] sm:$0xff] }
 0x92d   : > { %3776 = vmatprep.subr.mxu1 %v4100_v1 }
 0x935   : > { %v4003_v44 = vpop.eup %4002 }
 0x936   : > { %v1315_v45 = vmul.f32 %v4003_v44, %v4001_v40  ;;  %v3491_v40 = vld [vmem:[%s4980_s4 + $0x8] sm:$0xff]  ;;  %v4691_v44 = vsub.s32 3, %v4561_v10 }
 0x938   : > { %3774 = vmatmul.mubr.msk.f32.vlgmr.msra.gmra.mxu1 %vm1150_vm11, %v1315_v45  ;;  %v1619_v45 = vrot.slane %v4569_v12, %v4691_v44 }
 0x939   : > { %3778 = vmatprep.mubr.msk.f32.mxu1 %vm4112_vm4, %v4100_v1  ;;  %3777 = vmatpush3.msra.mxu1 %v1398_v46  ;;  %v4698_v46 = vld [vmem:[%s4984_s8 + $0x8] sm:$0xff] }
 0x93a   : > { %3781 = vmatprep.subr.mxu1 %v4100_v1 }
 0x9f8   : > { %v1389_v47 = vpop.f32.mrf.mxu1 }
 0x9f9   : > { %1394 = vrot.lane.b32.xlu1 %v1389_v47, %s4986_s24 }
 0x9fa   : > { %v3775_v48 = vpop.f32.mrf.mxu1 }
 0xa6b   : > { %v1395_v49 = vpop.permute.xlu1 %1394 }
 0xa6c   : > { %v1397_v50 = vsel %vm1061_vm8, %v1223_v32, %v1395_v49  ;;  %v1791_v49 = vrot.slane %v4698_v46, %v4564_v11 }
 0xa6d   : > { %3779 = vmatmul.mubr.msk.f32.vlgmr.msra.gmra.mxu1 %vm984_vm7, %v1397_v50 }
 0xa6e   : > { %3789 = vmatprep.mubr.msk.f32.mxu1 %vm4112_vm4, %v4100_v1  ;;  %3782 = vmatpush3.msra.mxu1 %v1479_v51 }
 0xa6f   : > { %3783 = vmatprep.subr.mxu1 %v4100_v1 }
 0xa70   : > { %3784 = vmatpush3.msra.mxu1 %v1478_v53 }
 0xa71   : > { %3785 = vmatprep.subr.mxu1 %v4100_v1 }
 0xa72   : > { %3786 = vmatpush3.msra.mxu1 %v1477_v54 }
 0xa73   : > { %3787 = vmatprep.subr.mxu1 %v4100_v1 }
 0xa74   : > { %3788 = vmatpush3.msra.mxu1 %v1476_v56 }
 0xa75   : > { %3803 = vmatprep.subr.mxu1 %v4100_v1 }
 0xb2d   : > { %v1472_v57 = vpop.f32.mrf.mxu1 }
 0xb2e   : > { %v4631_v58 = vadd.f32 %v1472_v57, %v1402_v55 }
 0xb2f   : > { %v3780_v59 = vpop.f32.mrf.mxu1 }
 0xb30   : > { %v1485_v60 = vrot.slane %v4631_v58, 5 }
 0xb32   : > { %v1488_v61 = vsel %vm1487_vm12, 0.0, %v1485_v60  ;;  %v1500_v0 = vrot.slane %v1485_v60, 3 }
 0xb33   : > { %v1494_v62 = vrot.slane %v1488_v61, 2  ;;  %v1490_v63 = vrot.slane %v1488_v61, 1  ;;  %v1499_v2 = vrot.slane %v1488_v61, 3 }
 0xb35   : > { %1495 = vrot.lane.b32.xlu0 %v1494_v62, %s4121_s28  ;;  %1491 = vrot.lane.b32.xlu1 %v1490_v63, %s4122_s14  ;;  %v1501_v3 = vsel %vm1498_vm13, %v1499_v2, %v1500_v0 }
 0xb39   : > { %1502 = vrot.lane.b32.xlu1 %v1501_v3, %s4123_s22 }
 0xba7   : > { %v1492_v4 = vpop.permute.xlu1 %1491  ;;  %v1496_v5 = vpop.permute.xlu0 %1495 }
 0xba8   : > { %v1505_v6 = vsel %vm984_vm7, %v1488_v61, %v1492_v4 }
 0xba9   : > { %v1507_v8 = vsel %vm1506_vm14, %v1505_v6, %v1496_v5 }
 0xbab   : > { %v1503_v9 = vpop.permute.xlu1 %1502 }
 0xbac   : > { %v1509_v13 = vsel %vm1508_vm15, %v1507_v8, %v1503_v9 }
 0xbad   : > { %3790 = vmatmul.mubr.msk.f32.vlgmr.msra.gmra.mxu1 %vm1514_vm0, %v1509_v13 }
 0xbae   : > { %3805 = vmatprep.mubr.msk.f32.mxu1 %vm4112_vm4, %v4100_v1  ;;  %3804 = vmatpush3.msra.mxu1 %v1706_v43 }
 0xbaf   : > { %3813 = vmatprep.subr.mxu1 %v4100_v1 }
 0xc6d   : > { %v1584_v17 = vpop.f32.mrf.mxu1 }
 0xc6e   : > { %v1585_v18 = vadd.f32 %v1584_v17, %v1513_v16 }
 0xc6f   : > { %v3791_v19 = vpop.f32.mrf.mxu1 }
 0xc70   : > { %v1589_v20 = vmin.f32 %v1585_v18, 0.0  ;;  %vm1588_vm1 = vcmp.gt.f32.partialorder %v1585_v18, 0.0 }
 0xc72   : > { %v1590_v21 = vmul.f32 1.442695, %v1589_v20 }
 0xc74   : > { %4004 = vpow2.f32 %v1590_v21 }
 0xc81   : > { %v4005_v24 = vpop.eup %4004 }
 0xc82   : > { %v3485_v26 = vadd.f32 -1.0, %v4005_v24 }
 0xc84   : > { %v1593_v27 = vsel %vm1588_vm1, %v1585_v18, %v3485_v26 }
 0xc85   : > { %v1595_v28 = vrot.slane %v1593_v27, 5 }
 0xc87   : > { %v1597_v29 = vsel %vm1487_vm12, 0.0, %v1595_v28  ;;  %v1608_v33 = vrot.slane %v1595_v28, 3 }
 0xc88   : > { %v1603_v30 = vrot.slane %v1597_v29, 2  ;;  %v1599_v31 = vrot.slane %v1597_v29, 1  ;;  %v1607_v32 = vrot.slane %v1597_v29, 3 }
 0xc8a   : > { %1604 = vrot.lane.b32.xlu1 %v1603_v30, %s4121_s28  ;;  %1600 = vrot.lane.b32.xlu0 %v1599_v31, %s4122_s14  ;;  %v1609_v34 = vsel %vm1498_vm13, %v1607_v32, %v1608_v33 }
 0xc8e   : > { %1610 = vrot.lane.b32.xlu0 %v1609_v34, %s4123_s22 }
 0xcfc   : > { %v1601_v35 = vpop.permute.xlu0 %1600  ;;  %v1605_v36 = vpop.permute.xlu1 %1604 }
 0xcfd   : > { %v1613_v37 = vsel %vm984_vm7, %v1597_v29, %v1601_v35 }
 0xcfe   : > { %v1614_v38 = vsel %vm1506_vm14, %v1613_v37, %v1605_v36  ;;  %v3501_v37 = vld [vmem:[%s4981_s5 + $0x8] sm:$0xff] }
 0xd00   : > { %v1611_v39 = vpop.permute.xlu0 %1610 }
 0xd01   : > { %v1615_v41 = vsel %vm1508_vm15, %v1614_v38, %v1611_v39 }
 0xd02   : > { %3801 = vmatmul.mubr.msk.f32.vlgmr.msra.gmra.mxu0 %vm1514_vm0, %v1615_v41 }
 0xd03   : > { %3809 = vmatpush3.msra.mxu0 %v3491_v40  ;;  %3810 = vmatprep.mubr.msk.f32.mxu0 %vm4112_vm4, %v4100_v1 }
 0xd04   : > { %3818 = vmatprep.subr.mxu0 %v4100_v1 }
 0xd06   : > { %3811 = vmatmul.mubr.msk.f32.vlgmr.msra.gmra.mxu0 %vm984_vm7, %v1792_v42 }
 0xd07   : > { %3820 = vmatprep.mubr.msk.f32.mxu0 %vm4112_vm4, %v4100_v1 }
 0xdc2   : > { %v1689_v47 = vpop.f32.mrf.mxu0 }
 0xdc3   : > { %v1690_v48 = vadd.f32 %v1689_v47, %v1619_v45  ;;  %v3506_v45 = vld [vmem:[%s4982_s6 + $0x58] sm:$0xff]  ;;  %v3505_v47 = vld [vmem:[%s4982_s6 + $0x50] sm:$0xff] }
 0xdc4   : > { %v3802_v50 = vpop.f32.mrf.mxu0 }
 0xdc5   : > { %v1694_v51 = vmin.f32 %v1690_v48, 0.0  ;;  %vm1693_vm2 = vcmp.gt.f32.partialorder %v1690_v48, 0.0  ;;  %v3503_v50 = vld [vmem:[%s4982_s6 + $0x40] sm:$0xff] }
 0xdc6   : > { %v1861_v53 = vpop.f32.mrf.mxu0 }
 0xdc7   : > { %v1695_v54 = vmul.f32 1.442695, %v1694_v51  ;;  %v1862_v55 = vadd.f32 %v1861_v53, %v1791_v49  ;;  %v2206_v49 = vrot.slane %v4698_v46, %v4616_v52 }
 0xdc8   : > { %v3812_v10 = vpop.f32.mrf.mxu0 }
 0xdc9   : > { %4006 = vpow2.f32 %v1695_v54  ;;  %2032 = vrot.lane.b32.xlu0 %v1862_v55, %s4994_s29  ;;  %1866 = vrot.lane.b32.xlu1 %v1862_v55, %s4993_s21 }
 0xdcd   : > { %2030 = vrot.lane.b32.xlu1 %v1862_v55, %s4992_s25  ;;  %s5000_s25 = smov 116  }
 0xdd6   : > { %v4007_v56 = vpop.eup %4006 }
 0xdd7   : > { %v3487_v57 = vadd.f32 -1.0, %v4007_v56 }
 0xdd9   : > { %v1698_v59 = vsel %vm1693_vm2, %v1690_v48, %v3487_v57  ;;  %v3504_v48 = vld [vmem:[%s4982_s6 + $0x48] sm:$0xff] }
 0xdda   : > { %v1699_v60 = vadd.f32 %v1698_v59, %v4631_v58 }
 0xddc   : > { %v1701_v61 = vmin.f32 %v1699_v60, 0.0  ;;  %vm1700_vm3 = vcmp.gt.f32.partialorder %v1699_v60, 0.0 }
 0xdde   : > { %v1702_v62 = vmul.f32 1.442695, %v1701_v61 }
 0xde0   : > { %4008 = vpow2.f32 %v1702_v62 }
 0xded   : > { %v4009_v63 = vpop.eup %4008 }
 0xdee   : > { %v3488_v0 = vadd.f32 -1.0, %v4009_v63 }
 0xdf0   : > { %v1705_v2 = vsel %vm1700_vm3, %v1699_v60, %v3488_v0 }
 0xdf1   : > { %v1708_v3 = vrot.slane %v1705_v2, 5 }
 0xdf3   : > { %3806 = vmatmul.mubr.msk.f32.vlgmr.msra.gmra.mxu1 %vm984_vm7, %v1708_v3 }
 0xdf4   : > { %3815 = vmatprep.mubr.msk.f32.mxu1 %vm4112_vm4, %v4100_v1 }
 0xe3b   : > { %v1867_v4 = vpop.permute.xlu1 %1866  ;;  %v2033_v5 = vpop.permute.xlu0 %2032 }
 0xe3c   : > { %3814 = vmatpush3.xpose.msk.msra.mxu1 %vm1061_vm8, %v1867_v4 }
 0xe3d   : > { %3823 = vmatprep.subr.mxu1 %v4100_v1 }
 0xe3f   : > { %3816 = vmatmul.mubr.msk.f32.vlgmr.msra.gmra.mxu1 %vm1061_vm8, %v1862_v55  ;;  %v2031_v58 = vpop.permute.xlu1 %2030 }
 0xe40   : > { %3824 = vmatpush3.xpose.msk.msra.mxu1 %vm1061_vm8, %v2033_v5  ;;  %3825 = vmatprep.mubr.msk.f32.mxu1 %vm4112_vm4, %v4100_v1  ;;  %v3510_v5 = vld [vmem:[%s4982_s6 + $0x78] sm:$0xff] }
 0xe41   : > { %3833 = vmatprep.subr.mxu1 %v4100_v1 }
 0xe43   : > { %3826 = vmatmul.mubr.msk.f32.vlgmr.msra.gmra.mxu1 %vm1061_vm8, %v2031_v58  ;;  %v2314_v58 = vrot.slane %v4698_v46, %v4651_v15 }
 0xe44   : > { %3835 = vmatprep.mubr.msk.f32.mxu1 %vm4112_vm4, %v4100_v1  ;;  %3834 = vmatpush3.msra.mxu1 %v3501_v37  ;;  %v2595_v37 = vrot.slane %v4555_v7, 2  ;;  %v4824_v7 = vld [vmem:[%s4984_s8 + $0x10] sm:$0xff] }
 0xe45   : > { %3849 = vmatprep.subr.mxu1 %v4100_v1 }
 0xeb3   : > { %v4719_v6 = vpop.f32.mrf.mxu1 }
 0xeb5   : > { %v3807_v8 = vpop.f32.mrf.mxu1 }
 0xeff   : > { %v1938_v9 = vpop.f32.mrf.mxu1 }
 0xf00   : > { %v1942_v13 = vsel %vm1136_vm9, %v1938_v9, -inf }
 0xf01   : > { %1943 = vmax.xlane.f32.xlu0 %v1942_v13  ;;  %v3817_v14 = vpop.f32.mrf.mxu1 }
 0xf03   : > { %v2104_v16 = vpop.f32.mrf.mxu1 }
 0xf04   : > { %v2108_v17 = vsel %vm1136_vm9, %v2104_v16, -inf }
 0xf05   : > { %2109 = vmax.xlane.f32.xlu1 %v2108_v17  ;;  %v3827_v18 = vpop.f32.mrf.mxu1  ;;  %v3509_v17 = vld [vmem:[%s4982_s6 + $0x70] sm:$0xff] }
 0xf06   : > { %v3508_v18 = vld [vmem:[%s4982_s6 + $0x68] sm:$0xff] }
 0xf16   : > { %1953 = vrot.lane.b32.xlu1 %v1862_v55, %s4997_s16 }
 0xf8a   : > { %v1944_v19 = vpop.xlane.xlu0 %1943 }
 0xf8b   : > { %v1945_v20 = vsub.f32 %v1938_v9, %v1944_v19 }
 0xf8d   : > { %v1946_v21 = vmul.f32 1.442695, %v1945_v20  ;;  %v3507_v20 = vld [vmem:[%s4982_s6 + $0x60] sm:$0xff] }
 0xf8e   : > { %v2110_v22 = vpop.xlane.xlu1 %2109 }
 0xf8f   : > { %4010 = vpow2.f32 %v1946_v21  ;;  %v2111_v23 = vsub.f32 %v2104_v16, %v2110_v22 }
 0xf91   : > { %v2112_v24 = vmul.f32 1.442695, %v2111_v23 }
 0xf92   : > { %v1954_v25 = vpop.permute.xlu1 %1953 }
 0xf93   : > { %4012 = vpow2.f32 %v2112_v24  ;;  %3819 = vmatpush3.msk.msra.mxu0 %vm1154_vm10, %v1954_v25 }
 0xf94   : > { %3828 = vmatprep.subr.mxu0 %v4100_v1 }
 0xf9c   : > { %v4011_v26 = vpop.eup %4010 }
 0xf9d   : > { %v1948_v27 = vsel %vm1136_vm9, %v4011_v26, 0.0 }
 0xf9e   : > { %1949 = vadd.xlane.f32.xlu0 %v1948_v27 }
 0xfa0   : > { %v4013_v28 = vpop.eup %4012 }
 0xfa1   : > { %v2114_v29 = vsel %vm1136_vm9, %v4013_v28, 0.0 }
 0xfa2   : > { %2115 = vadd.xlane.f32.xlu0 %v2114_v29 }
 0xfb8   : > { %2119 = vrot.lane.b32.xlu0 %v1862_v55, %s4998_s17 }
0x1027   : > { %v1950_v30 = vpop.xlane.xlu0 %1949 }
0x1028   : > { %4014 = vrcp.f32 %v1950_v30 }
0x102b   : > { %v2116_v31 = vpop.xlane.xlu0 %2115 }
0x102c   : > { %4016 = vrcp.f32 %v2116_v31 }
0x102f   : > { %v2120_v34 = vpop.permute.xlu0 %2119 }
0x1035   : > { %v4015_v32 = vpop.eup %4014 }
0x1036   : > { %v1952_v33 = vmul.f32 %v4015_v32, %v4011_v26 }
0x1038   : > { %3821 = vmatmul.mubr.msk.f32.vlgmr.msra.gmra.mxu0 %vm1150_vm11, %v1952_v33 }
0x1039   : > { %v4017_v35 = vpop.eup %4016  ;;  %3829 = vmatpush3.msk.msra.mxu0 %vm1154_vm10, %v2120_v34  ;;  %3830 = vmatprep.mubr.msk.f32.mxu0 %vm4112_vm4, %v4100_v1 }
0x103a   : > { %v2118_v36 = vmul.f32 %v4017_v35, %v4013_v28  ;;  %3838 = vmatprep.subr.mxu0 %v4100_v1  ;;  %v3519_v35 = vld [vmem:[%s4980_s4 + $0x10] sm:$0xff] }
0x103c   : > { %3831 = vmatmul.mubr.msk.f32.vlgmr.msra.gmra.mxu0 %vm1150_vm11, %v2118_v36 }
0x103d   : > { %3846 = vmatprep.mubr.msk.f32.mxu0 %vm4112_vm4, %v4100_v1  ;;  %3839 = vmatpush3.msra.mxu0 %v3506_v45 }
0x103e   : > { %3840 = vmatprep.subr.mxu0 %v4100_v1 }
0x103f   : > { %3841 = vmatpush3.msra.mxu0 %v3505_v47 }
0x1040   : > { %3842 = vmatprep.subr.mxu0 %v4100_v1 }
0x1041   : > { %3843 = vmatpush3.msra.mxu0 %v3504_v48 }
0x1042   : > { %3844 = vmatprep.subr.mxu0 %v4100_v1 }
0x1043   : > { %3845 = vmatpush3.msra.mxu0 %v3503_v50 }
0x1044   : > { %3860 = vmatprep.subr.mxu0 %v4100_v1 }
0x10f8   : > { %v2026_v38 = vpop.f32.mrf.mxu0 }
0x10fa   : > { %v3822_v39 = vpop.f32.mrf.mxu0 }
0x10fb   : > { %v2419_v39 = vrot.slane %v4698_v46, %v4691_v44 }
0x10fc   : > { %v2192_v40 = vpop.f32.mrf.mxu0 }
0x10fd   : > { %2197 = vrot.lane.b32.xlu1 %v2192_v40, %s4999_s23 }
0x10fe   : > { %v3832_v41 = vpop.f32.mrf.mxu0 }
0x116f   : > { %v2198_v42 = vpop.permute.xlu1 %2197 }
0x1170   : > { %v2200_v43 = vsel %vm1061_vm8, %v2026_v38, %v2198_v42  ;;  %v3516_v38 = vld [vmem:[%s4983_s7 + $0x8] sm:$0xff]  ;;  %v2594_v42 = vrot.slane %v4824_v7, %v4564_v11 }
0x1171   : > { %3836 = vmatmul.mubr.msk.f32.vlgmr.msra.gmra.mxu1 %vm984_vm7, %v2200_v43 }
0x1172   : > { %3857 = vmatprep.mubr.msk.f32.mxu1 %vm4112_vm4, %v4100_v1  ;;  %3850 = vmatpush3.msra.mxu1 %v3510_v5 }
0x1173   : > { %3851 = vmatprep.subr.mxu1 %v4100_v1 }
0x1174   : > { %3852 = vmatpush3.msra.mxu1 %v3509_v17 }
0x1175   : > { %3853 = vmatprep.subr.mxu1 %v4100_v1 }
0x1176   : > { %3854 = vmatpush3.msra.mxu1 %v3508_v18 }
0x1177   : > { %3855 = vmatprep.subr.mxu1 %v4100_v1 }
0x1178   : > { %3856 = vmatpush3.msra.mxu1 %v3507_v20 }
0x1179   : > { %3865 = vmatprep.subr.mxu1 %v4100_v1 }
0x1231   : > { %v2276_v51 = vpop.f32.mrf.mxu1 }
0x1232   : > { %v4763_v53 = vadd.f32 %v2276_v51, %v2206_v49 }
0x1233   : > { %v3837_v54 = vpop.f32.mrf.mxu1 }
0x1234   : > { %v2290_v55 = vrot.slane %v4763_v53, 5 }
0x1236   : > { %v2292_v10 = vsel %vm1487_vm12, 0.0, %v2290_v55  ;;  %v2303_v59 = vrot.slane %v2290_v55, 3 }
0x1237   : > { %v2298_v56 = vrot.slane %v2292_v10, 2  ;;  %v2294_v57 = vrot.slane %v2292_v10, 1  ;;  %v2302_v60 = vrot.slane %v2292_v10, 3 }
0x1239   : > { %2299 = vrot.lane.b32.xlu0 %v2298_v56, %s4121_s28  ;;  %2295 = vrot.lane.b32.xlu1 %v2294_v57, %s4122_s14  ;;  %v2304_v61 = vsel %vm1498_vm13, %v2302_v60, %v2303_v59 }
0x123d   : > { %2305 = vrot.lane.b32.xlu1 %v2304_v61, %s4123_s22 }
0x12ab   : > { %v2296_v62 = vpop.permute.xlu1 %2295  ;;  %v2300_v63 = vpop.permute.xlu0 %2299 }
0x12ac   : > { %v2308_v0 = vsel %vm984_vm7, %v2292_v10, %v2296_v62 }
0x12ad   : > { %v2309_v2 = vsel %vm1506_vm14, %v2308_v0, %v2300_v63  ;;  %v1710_v0 = vrot.slane %v4569_v12, 4 }
0x12af   : > { %v2306_v3 = vpop.permute.xlu1 %2305 }
0x12b0   : > { %v2310_v4 = vsel %vm1508_vm15, %v2309_v2, %v2306_v3  ;;  %v1781_v2 = vadd.f32 %v4719_v6, %v1710_v0 }
0x12b1   : > { %3847 = vmatmul.mubr.msk.f32.vlgmr.msra.gmra.mxu0 %vm1514_vm0, %v2310_v4 }
0x12b2   : > { %3862 = vmatprep.mubr.msk.f32.mxu0 %vm4112_vm4, %v4100_v1  ;;  %3861 = vmatpush3.msra.mxu0 %v3516_v38 }
0x12b3   : > { %3870 = vmatprep.subr.mxu0 %v4100_v1 }
0x1371   : > { %v2384_v8 = vpop.f32.mrf.mxu0 }
0x1372   : > { %v2385_v9 = vadd.f32 %v2384_v8, %v2314_v58 }
0x1373   : > { %v3848_v13 = vpop.f32.mrf.mxu0 }
0x1374   : > { %v2389_v14 = vmin.f32 %v2385_v9, 0.0  ;;  %vm2388_vm5 = vcmp.gt.f32.partialorder %v2385_v9, 0.0 }
0x1376   : > { %v2390_v16 = vmul.f32 1.442695, %v2389_v14 }
0x1378   : > { %4018 = vpow2.f32 %v2390_v16 }
0x1385   : > { %v4019_v19 = vpop.eup %4018 }
0x1386   : > { %v3512_v21 = vadd.f32 -1.0, %v4019_v19 }
0x1388   : > { %v2393_v22 = vsel %vm2388_vm5, %v2385_v9, %v3512_v21 }
0x1389   : > { %v2395_v23 = vrot.slane %v2393_v22, 5 }
0x138b   : > { %v2397_v24 = vsel %vm1487_vm12, 0.0, %v2395_v23  ;;  %v2408_v28 = vrot.slane %v2395_v23, 3 }
0x138c   : > { %v2403_v25 = vrot.slane %v2397_v24, 2  ;;  %v2399_v26 = vrot.slane %v2397_v24, 1  ;;  %v2407_v27 = vrot.slane %v2397_v24, 3 }
0x138e   : > { %2404 = vrot.lane.b32.xlu1 %v2403_v25, %s4121_s28  ;;  %2400 = vrot.lane.b32.xlu0 %v2399_v26, %s4122_s14  ;;  %v2409_v29 = vsel %vm1498_vm13, %v2407_v27, %v2408_v28 }
0x1392   : > { %2410 = vrot.lane.b32.xlu0 %v2409_v29, %s4123_s22 }
0x1400   : > { %v2401_v30 = vpop.permute.xlu0 %2400  ;;  %v2405_v31 = vpop.permute.xlu1 %2404 }
0x1401   : > { %v2413_v32 = vsel %vm984_vm7, %v2397_v24, %v2401_v30 }
0x1402   : > { %v2414_v33 = vsel %vm1506_vm14, %v2413_v32, %v2405_v31 }
0x1404   : > { %v2411_v34 = vpop.permute.xlu0 %2410 }
0x1405   : > { %v2415_v36 = vsel %vm1508_vm15, %v2414_v33, %v2411_v34  ;;  %v3529_v33 = vld [vmem:[%s4981_s5 + $0x10] sm:$0xff] }
0x1406   : > { %3858 = vmatmul.mubr.msk.f32.vlgmr.msra.gmra.mxu1 %vm1514_vm0, %v2415_v36 }
0x1407   : > { %3866 = vmatpush3.msra.mxu1 %v3519_v35  ;;  %3867 = vmatprep.mubr.msk.f32.mxu1 %vm4112_vm4, %v4100_v1 }
0x1408   : > { %3875 = vmatprep.subr.mxu1 %v4100_v1 }
0x140a   : > { %3868 = vmatmul.mubr.msk.f32.vlgmr.msra.gmra.mxu1 %vm984_vm7, %v2595_v37 }
0x140b   : > { %3877 = vmatprep.mubr.msk.f32.mxu1 %vm4112_vm4, %v4100_v1 }
0x14c6   : > { %v2489_v40 = vpop.f32.mrf.mxu1 }
0x14c7   : > { %v2490_v41 = vadd.f32 %v2489_v40, %v2419_v39  ;;  %v3534_v40 = vld [vmem:[%s4982_s6 + $0x98] sm:$0xff] }
0x14c8   : > { %v3859_v43 = vpop.f32.mrf.mxu1 }
0x14c9   : > { %v2494_v45 = vmin.f32 %v2490_v41, 0.0  ;;  %vm2493_vm6 = vcmp.gt.f32.partialorder %v2490_v41, 0.0  ;;  %v3009_v43 = vrot.slane %v4824_v7, %v4616_v52 }
0x14ca   : > { %v2664_v47 = vpop.f32.mrf.mxu1 }
0x14cb   : > { %v2495_v48 = vmul.f32 1.442695, %v2494_v45  ;;  %v2665_v49 = vadd.f32 %v2664_v47, %v2594_v42  ;;  %v3532_v42 = vld [vmem:[%s4982_s6 + $0x88] sm:$0xff]  ;;  %v3531_v45 = vld [vmem:[%s4982_s6 + $0x80] sm:$0xff] }
0x14cc   : > { %v3869_v50 = vpop.f32.mrf.mxu1 }
0x14cd   : > { %4020 = vpow2.f32 %v2495_v48  ;;  %2835 = vrot.lane.b32.xlu0 %v2665_v49, %s5000_s25  ;;  %2669 = vrot.lane.b32.xlu1 %v2665_v49, %s5001_s27 }
0x14d1   : > { %2833 = vrot.lane.b32.xlu1 %v2665_v49, %s5002_s26  ;;  %s4124_s26 = smov [#allocation2]  }
0x14da   : > { %v4021_v51 = vpop.eup %4020 }
0x14db   : > { %v3514_v54 = vadd.f32 -1.0, %v4021_v51 }
0x14dd   : > { %v2498_v55 = vsel %vm2493_vm6, %v2490_v41, %v3514_v54  ;;  %v3533_v41 = vld [vmem:[%s4982_s6 + $0x90] sm:$0xff] }
0x14de   : > { %v2499_v10 = vadd.f32 %v2498_v55, %v4763_v53 }
0x14e0   : > { %v2501_v11 = vmin.f32 %v2499_v10, 0.0  ;;  %vm2500_vm1 = vcmp.gt.f32.partialorder %v2499_v10, 0.0 }
0x14e2   : > { %v2502_v56 = vmul.f32 1.442695, %v2501_v11 }
0x14e4   : > { %4022 = vpow2.f32 %v2502_v56 }
0x14f1   : > { %v4023_v57 = vpop.eup %4022 }
0x14f2   : > { %v3515_v59 = vadd.f32 -1.0, %v4023_v57 }
0x14f4   : > { %v2505_v60 = vsel %vm2500_vm1, %v2499_v10, %v3515_v59 }
0x14f5   : > { %v2509_v61 = vrot.slane %v2505_v60, 5 }
0x14f7   : > { %3863 = vmatmul.mubr.msk.f32.vlgmr.msra.gmra.mxu0 %vm984_vm7, %v2509_v61 }
0x14f8   : > { %3872 = vmatprep.mubr.msk.f32.mxu0 %vm4112_vm4, %v4100_v1 }
0x153f   : > { %v2670_v62 = vpop.permute.xlu1 %2669  ;;  %v2836_v63 = vpop.permute.xlu0 %2835 }
0x1540   : > { %3871 = vmatpush3.xpose.msk.msra.mxu0 %vm1061_vm8, %v2670_v62 }
0x1541   : > { %3880 = vmatprep.subr.mxu0 %v4100_v1 }
0x1543   : > { %3873 = vmatmul.mubr.msk.f32.vlgmr.msra.gmra.mxu0 %vm1061_vm8, %v2665_v49  ;;  %v2834_v53 = vpop.permute.xlu1 %2833 }
0x1544   : > { %3881 = vmatpush3.xpose.msk.msra.mxu0 %vm1061_vm8, %v2836_v63  ;;  %3882 = vmatprep.mubr.msk.f32.mxu0 %vm4112_vm4, %v4100_v1  ;;  %v3538_v63 = vld [vmem:[%s4982_s6 + $0xb8] sm:$0xff] }
0x1545   : > { %3890 = vmatprep.subr.mxu0 %v4100_v1 }
0x1547   : > { %3883 = vmatmul.mubr.msk.f32.vlgmr.msra.gmra.mxu0 %vm1061_vm8, %v2834_v53  ;;  %v3117_v53 = vrot.slane %v4824_v7, %v4651_v15  ;;  %v3535_v15 = vld [vmem:[%s4982_s6 + $0xa0] sm:$0xff] }
0x1548   : > { %3892 = vmatprep.mubr.msk.f32.mxu0 %vm4112_vm4, %v4100_v1  ;;  %3891 = vmatpush3.msra.mxu0 %v3529_v33 }
0x1549   : > { %3906 = vmatprep.subr.mxu0 %v4100_v1 }
0x15b7   : > { %v2578_v3 = vpop.f32.mrf.mxu0 }
0x15b8   : > { %v4847_v4 = vadd.f32 %v2578_v3, %v1781_v2 }
0x15b9   : > { %v3864_v5 = vpop.f32.mrf.mxu0 }
0x1603   : > { %v2741_v58 = vpop.f32.mrf.mxu0 }
0x1604   : > { %v2745_v8 = vsel %vm1136_vm9, %v2741_v58, -inf }
0x1605   : > { %2746 = vmax.xlane.f32.xlu0 %v2745_v8  ;;  %v3874_v9 = vpop.f32.mrf.mxu0  ;;  %v3537_v8 = vld [vmem:[%s4982_s6 + $0xb0] sm:$0xff] }
0x1606   : > { %v3536_v9 = vld [vmem:[%s4982_s6 + $0xa8] sm:$0xff] }
0x1607   : > { %v2907_v13 = vpop.f32.mrf.mxu0 }
0x1608   : > { %v2911_v14 = vsel %vm1136_vm9, %v2907_v13, -inf }
0x1609   : > { %2912 = vmax.xlane.f32.xlu1 %v2911_v14  ;;  %v3884_v16 = vpop.f32.mrf.mxu0 }
0x161a   : > { %2756 = vrot.lane.b32.xlu1 %v2665_v49, %s4997_s16  ;;  %s4042_s16 = sshll.u32 %s4124_s26, 4  ;;  %s4043_s16 = int_to_ptr.vmem [resolvable:$false] %s4042_s16 }
0x168e   : > { %v2747_v17 = vpop.xlane.xlu0 %2746 }
0x168f   : > { %v2748_v12 = vsub.f32 %v2741_v58, %v2747_v17 }
0x1691   : > { %v2749_v18 = vmul.f32 1.442695, %v2748_v12 }
0x1692   : > { %v2913_v6 = vpop.xlane.xlu1 %2912 }
0x1693   : > { %4024 = vpow2.f32 %v2749_v18  ;;  %v2914_v19 = vsub.f32 %v2907_v13, %v2913_v6 }
0x1695   : > { %v2915_v20 = vmul.f32 1.442695, %v2914_v19 }
0x1696   : > { %v2757_v21 = vpop.permute.xlu1 %2756 }
0x1697   : > { %4026 = vpow2.f32 %v2915_v20  ;;  %3876 = vmatpush3.msk.msra.mxu1 %vm1154_vm10, %v2757_v21 }
0x1698   : > { %3885 = vmatprep.subr.mxu1 %v4100_v1 }
0x16a0   : > { %v4025_v22 = vpop.eup %4024 }
0x16a1   : > { %v2751_v23 = vsel %vm1136_vm9, %v4025_v22, 0.0 }
0x16a2   : > { %2752 = vadd.xlane.f32.xlu0 %v2751_v23 }
0x16a4   : > { %v4027_v24 = vpop.eup %4026 }
0x16a5   : > { %v2917_v25 = vsel %vm1136_vm9, %v4027_v24, 0.0 }
0x16a6   : > { %2918 = vadd.xlane.f32.xlu0 %v2917_v25 }
0x16bc   : > { %2922 = vrot.lane.b32.xlu0 %v2665_v49, %s4998_s17 }
0x172b   : > { %v2753_v26 = vpop.xlane.xlu0 %2752 }
0x172c   : > { %4028 = vrcp.f32 %v2753_v26 }
0x172f   : > { %v2919_v27 = vpop.xlane.xlu0 %2918 }
0x1730   : > { %4030 = vrcp.f32 %v2919_v27  ;;  %v3544_v27 = vld [vmem:[%s4983_s7 + $0x10] sm:$0xff] }
0x1733   : > { %v2923_v30 = vpop.permute.xlu0 %2922 }
0x1739   : > { %v4029_v28 = vpop.eup %4028 }
0x173a   : > { %v2755_v29 = vmul.f32 %v4029_v28, %v4025_v22  ;;  %v3222_v28 = vrot.slane %v4824_v7, %v4691_v44 }
0x173c   : > { %3878 = vmatmul.mubr.msk.f32.vlgmr.msra.gmra.mxu1 %vm1150_vm11, %v2755_v29 }
0x173d   : > { %v4031_v31 = vpop.eup %4030  ;;  %3886 = vmatpush3.msk.msra.mxu1 %vm1154_vm10, %v2923_v30  ;;  %3887 = vmatprep.mubr.msk.f32.mxu1 %vm4112_vm4, %v4100_v1  ;;  %vm3391_vm10 = vcmask 24576  }
0x173e   : > { %v2921_v32 = vmul.f32 %v4031_v31, %v4027_v24  ;;  %3895 = vmatprep.subr.mxu1 %v4100_v1 }
0x1740   : > { %3888 = vmatmul.mubr.msk.f32.vlgmr.msra.gmra.mxu1 %vm1150_vm11, %v2921_v32 }
0x1741   : > { %3903 = vmatprep.mubr.msk.f32.mxu1 %vm4112_vm4, %v4100_v1  ;;  %3896 = vmatpush3.msra.mxu1 %v3534_v40 }
0x1742   : > { %3897 = vmatprep.subr.mxu1 %v4100_v1 }
0x1743   : > { %3898 = vmatpush3.msra.mxu1 %v3533_v41 }
0x1744   : > { %3899 = vmatprep.subr.mxu1 %v4100_v1 }
0x1745   : > { %3900 = vmatpush3.msra.mxu1 %v3532_v42 }
0x1746   : > { %3901 = vmatprep.subr.mxu1 %v4100_v1 }
0x1747   : > { %3902 = vmatpush3.msra.mxu1 %v3531_v45 }
0x1748   : > { %3917 = vmatprep.subr.mxu1 %v4100_v1 }
0x17fc   : > { %v2829_v34 = vpop.f32.mrf.mxu1 }
0x17fe   : > { %v3879_v35 = vpop.f32.mrf.mxu1 }
0x1800   : > { %v2995_v36 = vpop.f32.mrf.mxu1 }
0x1801   : > { %3000 = vrot.lane.b32.xlu1 %v2995_v36, %s4999_s23 }
0x1802   : > { %v3889_v37 = vpop.f32.mrf.mxu1 }
0x1873   : > { %v3001_v38 = vpop.permute.xlu1 %3000 }
0x1874   : > { %v3003_v39 = vsel %vm1061_vm8, %v2829_v34, %v3001_v38 }
0x1875   : > { %3893 = vmatmul.mubr.msk.f32.vlgmr.msra.gmra.mxu0 %vm984_vm7, %v3003_v39 }
0x1876   : > { %3914 = vmatprep.mubr.msk.f32.mxu0 %vm4112_vm4, %v4100_v1  ;;  %3907 = vmatpush3.msra.mxu0 %v3538_v63 }
0x1877   : > { %3908 = vmatprep.subr.mxu0 %v4100_v1 }
0x1878   : > { %3909 = vmatpush3.msra.mxu0 %v3537_v8 }
0x1879   : > { %3910 = vmatprep.subr.mxu0 %v4100_v1 }
0x187a   : > { %3911 = vmatpush3.msra.mxu0 %v3536_v9 }
0x187b   : > { %3912 = vmatprep.subr.mxu0 %v4100_v1 }
0x187c   : > { %3913 = vmatpush3.msra.mxu0 %v3535_v15 }
0x1935   : > { %v3079_v47 = vpop.f32.mrf.mxu0 }
0x1936   : > { %v4891_v48 = vadd.f32 %v3079_v47, %v3009_v43  ;;  %v2584_v43 = vrot.slane %v4698_v46, 4  ;;  %v3387_v47 = vrot.slane %v4824_v7, 4 }
0x1937   : > { %v3894_v49 = vpop.f32.mrf.mxu0 }
0x1938   : > { %v3093_v50 = vrot.slane %v4891_v48, 5  ;;  %v2586_v45 = vadd.f32 %v2584_v43, %v4847_v4 }
0x193a   : > { %v3095_v52 = vsel %vm1487_vm12, 0.0, %v3093_v50  ;;  %v3106_v55 = vrot.slane %v3093_v50, 3 }
0x193b   : > { %v3101_v51 = vrot.slane %v3095_v52, 2  ;;  %v3097_v54 = vrot.slane %v3095_v52, 1  ;;  %v3105_v10 = vrot.slane %v3095_v52, 3 }
0x193d   : > { %3102 = vrot.lane.b32.xlu0 %v3101_v51, %s4121_s28  ;;  %3098 = vrot.lane.b32.xlu1 %v3097_v54, %s4122_s14  ;;  %v3107_v11 = vsel %vm1498_vm13, %v3105_v10, %v3106_v55 }
0x1941   : > { %3108 = vrot.lane.b32.xlu1 %v3107_v11, %s4123_s22 }
0x19af   : > { %v3099_v56 = vpop.permute.xlu1 %3098  ;;  %v3103_v57 = vpop.permute.xlu0 %3102 }
0x19b0   : > { %v3111_v59 = vsel %vm984_vm7, %v3095_v52, %v3099_v56 }
0x19b1   : > { %v3112_v60 = vsel %vm1506_vm14, %v3111_v59, %v3103_v57 }
0x19b3   : > { %v3109_v61 = vpop.permute.xlu1 %3108 }
0x19b4   : > { %v3113_v62 = vsel %vm1508_vm15, %v3112_v60, %v3109_v61 }
0x19b5   : > { %3904 = vmatmul.mubr.msk.f32.vlgmr.msra.gmra.mxu1 %vm1514_vm0, %v3113_v62 }
0x19b6   : > { %3919 = vmatprep.mubr.msk.f32.mxu1 %vm4112_vm4, %v4100_v1  ;;  %3918 = vmatpush3.msra.mxu1 %v3544_v27 }
0x1a75   : > { %v3187_v0 = vpop.f32.mrf.mxu1 }
0x1a76   : > { %v3188_v2 = vadd.f32 %v3187_v0, %v3117_v53 }
0x1a77   : > { %v3905_v3 = vpop.f32.mrf.mxu1 }
0x1a78   : > { %v3192_v5 = vmin.f32 %v3188_v2, 0.0  ;;  %vm3191_vm4 = vcmp.gt.f32.partialorder %v3188_v2, 0.0 }
0x1a7a   : > { %v3193_v58 = vmul.f32 1.442695, %v3192_v5 }
0x1a7c   : > { %4032 = vpow2.f32 %v3193_v58 }
0x1a89   : > { %v4033_v13 = vpop.eup %4032 }
0x1a8a   : > { %v3540_v14 = vadd.f32 -1.0, %v4033_v13 }
0x1a8c   : > { %v3196_v16 = vsel %vm3191_vm4, %v3188_v2, %v3540_v14 }
0x1a8d   : > { %v3198_v17 = vrot.slane %v3196_v16, 5 }
0x1a8f   : > { %v3200_v12 = vsel %vm1487_vm12, 0.0, %v3198_v17  ;;  %v3211_v20 = vrot.slane %v3198_v17, 3 }
0x1a90   : > { %v3206_v18 = vrot.slane %v3200_v12, 2  ;;  %v3202_v6 = vrot.slane %v3200_v12, 1  ;;  %v3210_v19 = vrot.slane %v3200_v12, 3 }
0x1a92   : > { %3207 = vrot.lane.b32.xlu1 %v3206_v18, %s4121_s28  ;;  %3203 = vrot.lane.b32.xlu0 %v3202_v6, %s4122_s14  ;;  %v3212_v1 = vsel %vm1498_vm13, %v3210_v19, %v3211_v20  ;;  %s323_s28 = sand.u32 1, %s4090_s10   ;;  %s3546_s14 = sshll.u32 %s4196_s13, 4 }
0x1a93   : > { %s3404_s25 = scalar_lea.hbm %s4985_s9, %s3546_s14  ;;  %s3394_s23 = scalar_lea.sflag [#allocation3], %s323_s28 }
0x1a94   : > { %s4044_s13 = scalar_lea.vmem %s4043_s16, 32 }
0x1a96   : > { %3213 = vrot.lane.b32.xlu0 %v3212_v1, %s4123_s22  ;;  %s324_s22 = scalar_lea.vmem [#allocation2], %s323_s28 }
0x1a97   : > { %s3406_s24 = sshll.u32 %s324_s22, 4  ;;  %s3407_s24 = int_to_ptr.vmem [resolvable:$true] %s3406_s24 }
0x1a98   : > { %s4038_s27 = scalar_lea.vmem %s3407_s24, 16  ;;  %p4045_p0 = scmp.lt.s32.totalorder %s3407_s24, %s4043_s16 }
0x1a99   : > { %p4039_p11 = scmp.ne.s32.totalorder %s3407_s24, %s4038_s27  ;;  %p4046_p1 = scmp.lt.s32.totalorder %s4044_s13, %s4038_s27 }
0x1a9b   : > { %p4040_p12 = pnand %p4039_p11, %p4213_p5  ;;  %p4047_p2 = por %p4046_p1, %p4045_p0 }
0x1a9d   : > { %p4041_p13 = pneg %p4040_p12 }
0x1a9f   : > { %p4048_p3 = pnand %p4047_p2, %p4041_p13 }
0x1b04   : > { %v3204_v21 = vpop.permute.xlu0 %3203  ;;  %v3208_v22 = vpop.permute.xlu1 %3207 }
0x1b05   : > { %v3216_v23 = vsel %vm984_vm7, %v3200_v12, %v3204_v21 }
0x1b06   : > { %v3217_v24 = vsel %vm1506_vm14, %v3216_v23, %v3208_v22 }
0x1b08   : > { %v3214_v25 = vpop.permute.xlu0 %3213 }
0x1b09   : > { %v3218_v26 = vsel %vm1508_vm15, %v3217_v24, %v3214_v25 }
0x1b0a   : > { %3915 = vmatmul.mubr.msk.f32.vlgmr.msra.gmra.mxu0 %vm1514_vm0, %v3218_v26 }
0x1bca   : > { %v3292_v29 = vpop.f32.mrf.mxu0 }
0x1bcb   : > { %v3293_v30 = vadd.f32 %v3292_v29, %v3222_v28 }
0x1bcc   : > { %v3916_v31 = vpop.f32.mrf.mxu0 }
0x1bcd   : > { %v3297_v32 = vmin.f32 %v3293_v30, 0.0  ;;  %vm3296_vm8 = vcmp.gt.f32.partialorder %v3293_v30, 0.0 }
0x1bcf   : > { %v3298_v33 = vmul.f32 1.442695, %v3297_v32 }
0x1bd1   : > { %4034 = vpow2.f32 %v3298_v33 }
0x1bde   : > { %v4035_v34 = vpop.eup %4034 }
0x1bdf   : > { %v3542_v35 = vadd.f32 -1.0, %v4035_v34 }
0x1be1   : > { %v3301_v36 = vsel %vm3296_vm8, %v3293_v30, %v3542_v35 }
0x1be2   : > { %v3302_v37 = vadd.f32 %v3301_v36, %v4891_v48 }
0x1be4   : > { %v3304_v38 = vmin.f32 %v3302_v37, 0.0  ;;  %vm3303_vm9 = vcmp.gt.f32.partialorder %v3302_v37, 0.0 }
0x1be6   : > { %v3305_v39 = vmul.f32 1.442695, %v3304_v38 }
0x1be8   : > { %4036 = vpow2.f32 %v3305_v39 }
0x1bf5   : > { %v4037_v40 = vpop.eup %4036 }
0x1bf6   : > { %v3543_v41 = vadd.f32 -1.0, %v4037_v40 }
0x1bf8   : > { %v3308_v44 = vsel %vm3303_vm9, %v3302_v37, %v3543_v41 }
0x1bf9   : > { %v3312_v42 = vrot.slane %v3308_v44, 5 }
0x1bfb   : > { %3920 = vmatmul.mubr.msk.f32.vlgmr.msra.gmra.mxu1 %vm984_vm7, %v3312_v42 }
0x1cbb   : > { %v3381_v48 = vpop.f32.mrf.mxu1 }
0x1cbc   : > { %v3385_v49 = vadd.f32 %v3381_v48, %v2586_v45 }
0x1cbd   : > { %v3921_v50 = vpop.f32.mrf.mxu1 }
0x1cbe   : > { %v3389_v52 = vadd.f32 %v3387_v47, %v3385_v49 }
0x1cc0   : > { %v3390_v51 = vmul.f32 0.33333334, %v3389_v52 }
0x1cc2   : > { %3392 = vst.msk [vmem:[%s324_s22] sm:$0x1] %vm3391_vm10, %v3390_v51 }
0x1cc3   : > { %4051 = shalt.err (!%p4048_p3)
}
0x1cc4   : > { %s4052_s17 = scalar_lea.hbm %s3404_s25, 16  ;;  %s4056_s22 = scalar_lea.hbm %s4985_s9, 32 }
0x1cc5   : > { %p4053_p4 = scmp.ne.s32.totalorder %s3404_s25, %s4052_s17  ;;  %p4057_p9 = scmp.lt.s32.totalorder %s3404_s25, %s4985_s9 }
0x1cc6   : > { %p4058_p10 = scmp.lt.s32.totalorder %s4056_s22, %s4052_s17 }
0x1cc7   : > { %p4054_p7 = pnand %p4053_p4, %p4213_p5 }
0x1cc8   : > { %p4059_p11 = por %p4058_p10, %p4057_p9 }
0x1cc9   : > { %p4055_p8 = pneg %p4054_p7 }
0x1ccb   : > { %p4060_p12 = pnand %p4059_p11, %p4055_p8 }
0x1ccd   : > { %4063 = shalt.err (!%p4060_p12)
}
0x1cce   : > { %3922 = dma.vmem_to_hbm [thread:$0]  (%p4213_p5), %s3407_s24, 16, %s3404_s25, %s3394_s23  }
0x1ccf PF: > { %p3928_p13 = scmp.ge.s32.totalorder %s4098_s12, 2  ;;  %s3418_s27 = sand.u32 1, %s4086_s30  }
0x1cd0   : > { %s3419_s26 = scalar_lea.sflag [#allocation3], %s3418_s27 }
0x1cd1   : > { %p3925_p0 = pnand %p3928_p13, %p4217_p6 }
0x1cd3   : > { %p3926_p1 = pneg %p3925_p0 }
0x1cd5   : > { %4081 = dma.done.wait (%p3926_p1), %s3419_s26, 16  }
0x1cd6   : > { %4083 = vsyncadd (%p3926_p1), %s3419_s26, 4294967280  ;;  %p19_p2 = scmp.ge.s32.totalorder %s4200_s15, 4   ;;  %s5003_s30 = smov %s4090_s10 }
0x1cd7   : > { %s5004_s10 = smov %s4094_s11  ;;  %s5005_s11 = smov %s4211_s18 }
0x1cd8   : > { %s5006_s12 = smov %s4200_s15  ;;  %21 = sbr.rel (!%p19_p2) target bundleno = 3 (0x3), region = 101 }
0x1cdd   :  { %3423 = vsyncpa [#allocation3], 1 }
0x1cde   :  { %3425 = vsyncpa [#allocation3 + $0x1], 1 }

</bundles_post_ra>
